<compile_context>
chip_gen: v7x
topology: tpu7x:2x2x1
jax: 0.10.0
libtpu: 0.0.40
codegen_flags: <defaults>
</compile_context>

<pallas_src>
import jax
import jax.numpy as jnp
from jax.experimental import pallas as pl
from jax.experimental.pallas import tpu as pltpu

B, S, D, H, FF = 2, 8, 32, 4, 128
DH = D // H
EPS = 1e-5


def _full_spec(shape):
    # Whole-array block, independent of the (batch) grid index.
    return pl.BlockSpec(shape, lambda b, _n=len(shape): (0,) * _n)


def _layernorm(x, g, b):
    mu = jnp.mean(x, axis=-1, keepdims=True)
    var = jnp.mean((x - mu) ** 2, axis=-1, keepdims=True)
    return (x - mu) * jax.lax.rsqrt(var + EPS) * g + b


# --------------------------- fused layer kernel ------------------------------
def transformer_layer_kernel(
    x0_ref, x1_ref,
    wqkv_ref, bqkv_ref, wo_ref, bo_ref,
    w1_ref, b1_ref, w2_ref, b2_ref,
    ln1_g_ref, ln1_b_ref, ln2_g_ref, ln2_b_ref,
    y0_ref, y1_ref, attn_ref,
):
    x0 = x0_ref[0]  # (S, D)
    x1 = x1_ref[0]  # (S, D)

    # ------------------ multi-head self-attention ------------------
    # Fused QKV: one batched contraction over the stacked (3H, D, DH) weight,
    # then static leading-axis slices (no lane relayout, no per-head loop).
    xg = jnp.broadcast_to(x0, (3 * H, S, D))
    qkv = jnp.einsum('gsd,gdk->gsk', xg, wqkv_ref[...],
                     preferred_element_type=jnp.float32) + bqkv_ref[...]
    q = qkv[0:H] * (1.0 / (DH ** 0.5))      # scale folded into q
    k = qkv[H:2 * H]
    v = qkv[2 * H:3 * H]

    scores = jnp.einsum('hsk,htk->hst', q, k,
                        preferred_element_type=jnp.float32)          # (H,S,S)
    scores = scores - jnp.max(scores, axis=-1, keepdims=True)
    e = jnp.exp(scores)
    # Softmax denominator via EUP approximate reciprocal (frees the VALU divide).
    p = e * pl.reciprocal(jnp.sum(e, axis=-1, keepdims=True), approx=True)
    attn_ref[0] = p  # single store of the whole (H, S, S) slab

    ctx = jnp.einsum('hst,htk->hsk', p, v,
                     preferred_element_type=jnp.float32)             # (H,S,DH)
    att_out = jnp.sum(
        jnp.einsum('hsk,hkd->hsd', ctx, wo_ref[...],
                   preferred_element_type=jnp.float32),
        axis=0) + bo_ref[0]                                          # (S, D)

    # ------------------ ResiDual residual + LayerNorm 1 ------------------
    #   x0 <- LN1(x0 + att_out) ; x1 <- x1 + att_out
    s1 = x0 + att_out
    x1 = x1 + att_out
    x0n = _layernorm(s1, ln1_g_ref[0], ln1_b_ref[0])

    # ------------------------- feed-forward -------------------------
    h1 = jnp.dot(x0n, w1_ref[...], preferred_element_type=jnp.float32) + b1_ref[0]
    h1 = jax.nn.gelu(h1, approximate=True)
    ff_out = jnp.dot(h1, w2_ref[...], preferred_element_type=jnp.float32) + b2_ref[0]

    # ------------------ ResiDual residual + LayerNorm 2 ------------------
    #   y0 <- LN2(x0 + ff_out) ; y1 <- x1 + ff_out
    s2 = x0n + ff_out
    y1_ref[0] = x1 + ff_out
    y0_ref[0] = _layernorm(s2, ln2_g_ref[0], ln2_b_ref[0])


# ------------------------------ full layer -----------------------------------
def transformer_layer(x, params):
    """ResiDual TransformerLayer forward.  x: (B,S,D) array or tuple (x0, x1).

    Returns ((x0, x1), att_matrix, xatt_matrix).  drop_path / LayerScale are
    identity (drop_path=0, init_values=None); cross-attention is None.
    """
    if not isinstance(x, tuple):
        x = (x, x)
    x0_in, x1_in = x

    # Host-side weight restructuring (free XLA reshapes/concats, done once under jit).
    def per_head(w):  # (D, D) -> (H, D, DH)
        return w.reshape(D, H, DH).transpose(1, 0, 2)

    wqkv_h = jnp.concatenate(
        [per_head(params["wq"]), per_head(params["wk"]), per_head(params["wv"])],
        axis=0)                                                      # (3H, D, DH)
    bqkv_h = jnp.concatenate(
        [params["bq"].reshape(H, 1, DH), params["bk"].reshape(H, 1, DH),
         params["bv"].reshape(H, 1, DH)], axis=0)                    # (3H, 1, DH)
    wo_h = params["wo"].reshape(H, DH, D)                            # (H, DH, D)
    bo = params["bo"].reshape(1, D)
    w1, b1 = params["w1"], params["b1"].reshape(1, FF)
    w2, b2 = params["w2"], params["b2"].reshape(1, D)
    ln1_g, ln1_b = params["ln1_g"].reshape(1, D), params["ln1_b"].reshape(1, D)
    ln2_g, ln2_b = params["ln2_g"].reshape(1, D), params["ln2_b"].reshape(1, D)

    y0, y1, attn = pl.pallas_call(
        transformer_layer_kernel,
        out_shape=(
            jax.ShapeDtypeStruct((B, S, D), jnp.float32),
            jax.ShapeDtypeStruct((B, S, D), jnp.float32),
            jax.ShapeDtypeStruct((B, H, S, S), jnp.float32),
        ),
        grid=(B,),
        in_specs=[
            pl.BlockSpec((1, S, D), lambda b: (b, 0, 0)),
            pl.BlockSpec((1, S, D), lambda b: (b, 0, 0)),
            _full_spec((3 * H, D, DH)), _full_spec((3 * H, 1, DH)),
            _full_spec((H, DH, D)), _full_spec((1, D)),
            _full_spec((D, FF)), _full_spec((1, FF)),
            _full_spec((FF, D)), _full_spec((1, D)),
            _full_spec((1, D)), _full_spec((1, D)),
            _full_spec((1, D)), _full_spec((1, D)),
        ],
        out_specs=(
            pl.BlockSpec((1, S, D), lambda b: (b, 0, 0)),
            pl.BlockSpec((1, S, D), lambda b: (b, 0, 0)),
            pl.BlockSpec((1, H, S, S), lambda b: (b, 0, 0, 0)),
        ),
        # Batch axis is independent -> "parallel" lets a 2-TC chip (v7x) split it.
        compiler_params=pltpu.CompilerParams(dimension_semantics=("parallel",)),
    )(x0_in, x1_in, wqkv_h, bqkv_h, wo_h, bo,
      w1, b1, w2, b2, ln1_g, ln1_b, ln2_g, ln2_b)

    # cross_attention_layer is None -> xatt_matrix is None
    return (y0, y1), attn, None


# --------------------------- pure-JAX reference -------------------------------
def transformer_layer_ref(x, params):
    if not isinstance(x, tuple):
        x = (x, x)
    x0, x1 = x

    def heads(t):  # (B,S,D) -> (B,H,S,DH)
        return t.reshape(B, S, H, DH).transpose(0, 2, 1, 3)

    q = heads(x0 @ params["wq"] + params["bq"])
    k = heads(x0 @ params["wk"] + params["bk"])
    v = heads(x0 @ params["wv"] + params["bv"])
    scores = jnp.einsum('bhsd,bhtd->bhst', q, k) / (DH ** 0.5)
    p = jax.nn.softmax(scores, axis=-1)
    ctx = jnp.einsum('bhst,bhtd->bhsd', p, v)
    ctx = ctx.transpose(0, 2, 1, 3).reshape(B, S, D)
    att_out = ctx @ params["wo"] + params["bo"]

    def ln(t, g, b):
        mu = t.mean(-1, keepdims=True)
        var = ((t - mu) ** 2).mean(-1, keepdims=True)
        return (t - mu) / jnp.sqrt(var + EPS) * g + b

    x0n = ln(x0 + att_out, params["ln1_g"], params["ln1_b"])
    x1 = x1 + att_out
    h = jax.nn.gelu(x0n @ params["w1"] + params["b1"], approximate=True)
    ff = h @ params["w2"] + params["b2"]
    y0 = ln(x0n + ff, params["ln2_g"], params["ln2_b"])
    y1 = x1 + ff
    return (y0, y1), p, None


# ------------------------------ param init -----------------------------------
def init_params(key):
    ks = jax.random.split(key, 8)
    sd_d = 1.0 / (D ** 0.5)
    sd_ff = 1.0 / (FF ** 0.5)
    return {
        "wq": jax.random.normal(ks[0], (D, D), jnp.float32) * sd_d,
        "bq": jnp.zeros((D,), jnp.float32),
        "wk": jax.random.normal(ks[1], (D, D), jnp.float32) * sd_d,
        "bk": jnp.zeros((D,), jnp.float32),
        "wv": jax.random.normal(ks[2], (D, D), jnp.float32) * sd_d,
        "bv": jnp.zeros((D,), jnp.float32),
        "wo": jax.random.normal(ks[3], (D, D), jnp.float32) * sd_d,
        "bo": jnp.zeros((D,), jnp.float32),
        "w1": jax.random.normal(ks[4], (D, FF), jnp.float32) * sd_d,
        "b1": jnp.zeros((FF,), jnp.float32),
        "w2": jax.random.normal(ks[5], (FF, D), jnp.float32) * sd_ff,
        "b2": jnp.zeros((D,), jnp.float32),
        "ln1_g": jnp.ones((D,), jnp.float32),
        "ln1_b": jnp.zeros((D,), jnp.float32),
        "ln2_g": jnp.ones((D,), jnp.float32),
        "ln2_b": jnp.zeros((D,), jnp.float32),
    }


if __name__ == "__main__":
    key = jax.random.PRNGKey(0)
    pkey, xkey = jax.random.split(key)
    params = init_params(pkey)
    x = jax.random.normal(xkey, (B, S, D), jnp.float32)

    (x0, x1), att_matrix, xatt_matrix = jax.jit(transformer_layer)(x, params)
    jax.block_until_ready((x0, x1, att_matrix))

    (r0, r1), ratt, _ = transformer_layer_ref(x, params)

    assert x0.shape == (B, S, D) and x1.shape == (B, S, D)
    assert att_matrix.shape == (B, H, S, S)
    assert xatt_matrix is None
    assert bool(jnp.all(jnp.isfinite(x0))) and bool(jnp.all(jnp.isfinite(x1)))
    assert bool(jnp.all(jnp.isfinite(att_matrix)))
    # Loose tolerance: kernel uses EUP approximate reciprocal in the softmax.
    assert bool(jnp.allclose(x0, r0, atol=2e-2, rtol=2e-2))
    assert bool(jnp.allclose(x1, r1, atol=2e-2, rtol=2e-2))
    assert bool(jnp.allclose(att_matrix, ratt, atol=2e-2, rtol=2e-2))
    print("KERNEL_OK")
</pallas_src>

<mosaic_0001>
module attributes {stable_mosaic.version = 11 : i64} {
  func.func @transformer_layer_kernel(%arg0: i32, %arg1: memref<1x8x32xf32, #tpu.memory_space<vmem>>, %arg2: memref<1x8x32xf32, #tpu.memory_space<vmem>>, %arg3: memref<12x32x8xf32, #tpu.memory_space<vmem>>, %arg4: memref<12x1x8xf32, #tpu.memory_space<vmem>>, %arg5: memref<4x8x32xf32, #tpu.memory_space<vmem>>, %arg6: memref<1x32xf32, #tpu.memory_space<vmem>>, %arg7: memref<32x128xf32, #tpu.memory_space<vmem>>, %arg8: memref<1x128xf32, #tpu.memory_space<vmem>>, %arg9: memref<128x32xf32, #tpu.memory_space<vmem>>, %arg10: memref<1x32xf32, #tpu.memory_space<vmem>>, %arg11: memref<1x32xf32, #tpu.memory_space<vmem>>, %arg12: memref<1x32xf32, #tpu.memory_space<vmem>>, %arg13: memref<1x32xf32, #tpu.memory_space<vmem>>, %arg14: memref<1x32xf32, #tpu.memory_space<vmem>>, %arg15: memref<1x8x32xf32, #tpu.memory_space<vmem>>, %arg16: memref<1x8x32xf32, #tpu.memory_space<vmem>>, %arg17: memref<1x4x8x8xf32, #tpu.memory_space<vmem>>) attributes {dimension_semantics = [#tpu.dimension_semantics<parallel>], iteration_bounds = array<i64: 2>, scalar_prefetch = 0 : i64, scratch_operands = 0 : i64, tpu.core_type = #tpu.core_type<tc>, window_params = [{transform_indices = @transform_0, window_bounds = array<i64: 1, 8, 32>}, {transform_indices = @transform_1, window_bounds = array<i64: 1, 8, 32>}, {pipeline_mode = #tpu.pipeline_mode<synchronous>, transform_indices = @transform_2, window_bounds = array<i64: 12, 32, 8>}, {pipeline_mode = #tpu.pipeline_mode<synchronous>, transform_indices = @transform_3, window_bounds = array<i64: 12, 1, 8>}, {pipeline_mode = #tpu.pipeline_mode<synchronous>, transform_indices = @transform_4, window_bounds = array<i64: 4, 8, 32>}, {pipeline_mode = #tpu.pipeline_mode<synchronous>, transform_indices = @transform_5, window_bounds = array<i64: 1, 32>}, {pipeline_mode = #tpu.pipeline_mode<synchronous>, transform_indices = @transform_6, window_bounds = array<i64: 32, 128>}, {pipeline_mode = #tpu.pipeline_mode<synchronous>, transform_indices = @transform_7, window_bounds = array<i64: 1, 128>}, {pipeline_mode = #tpu.pipeline_mode<synchronous>, transform_indices = @transform_8, window_bounds = array<i64: 128, 32>}, {pipeline_mode = #tpu.pipeline_mode<synchronous>, transform_indices = @transform_9, window_bounds = array<i64: 1, 32>}, {pipeline_mode = #tpu.pipeline_mode<synchronous>, transform_indices = @transform_10, window_bounds = array<i64: 1, 32>}, {pipeline_mode = #tpu.pipeline_mode<synchronous>, transform_indices = @transform_11, window_bounds = array<i64: 1, 32>}, {pipeline_mode = #tpu.pipeline_mode<synchronous>, transform_indices = @transform_12, window_bounds = array<i64: 1, 32>}, {pipeline_mode = #tpu.pipeline_mode<synchronous>, transform_indices = @transform_13, window_bounds = array<i64: 1, 32>}, {transform_indices = @transform_14, window_bounds = array<i64: 1, 8, 32>}, {transform_indices = @transform_15, window_bounds = array<i64: 1, 8, 32>}, {transform_indices = @transform_16, window_bounds = array<i64: 1, 4, 8, 8>}]} {
    %c0 = arith.constant 0 : index
    %c0_0 = arith.constant 0 : index
    %c0_1 = arith.constant 0 : index
    %0 = vector.load %arg1[%c0, %c0_0, %c0_1] : memref<1x8x32xf32, #tpu.memory_space<vmem>>, vector<1x8x32xf32>
    %1 = vector.shape_cast %0 : vector<1x8x32xf32> to vector<8x32xf32>
    %c0_2 = arith.constant 0 : index
    %c0_3 = arith.constant 0 : index
    %c0_4 = arith.constant 0 : index
    %2 = vector.load %arg2[%c0_2, %c0_3, %c0_4] : memref<1x8x32xf32, #tpu.memory_space<vmem>>, vector<1x8x32xf32>
    %3 = vector.shape_cast %2 : vector<1x8x32xf32> to vector<8x32xf32>
    %4 = vector.shape_cast %1 : vector<8x32xf32> to vector<1x8x32xf32>
    %5 = vector.broadcast %4 : vector<1x8x32xf32> to vector<12x8x32xf32>
    %c0_5 = arith.constant 0 : index
    %c0_6 = arith.constant 0 : index
    %c0_7 = arith.constant 0 : index
    %6 = vector.load %arg3[%c0_5, %c0_6, %c0_7] : memref<12x32x8xf32, #tpu.memory_space<vmem>>, vector<12x32x8xf32>
    "tpu.trace_start"() <{level = 10 : i32, message = "gsd,gdk->gsk"}> : () -> ()
    %cst = arith.constant dense<0.000000e+00> : vector<12x8x8xf32>
    %7 = tpu.matmul %5, %6, %cst {dimension_numbers = #tpu.dot_dimension_numbers<[2], [1], [1], [2], [0, 0, 0, 1, 1, 2], [0], [0]>} : vector<12x8x32xf32>, vector<12x32x8xf32>, vector<12x8x8xf32> -> vector<12x8x8xf32>
    "tpu.trace_stop"() : () -> ()
    %c0_8 = arith.constant 0 : index
    %c0_9 = arith.constant 0 : index
    %c0_10 = arith.constant 0 : index
    %8 = vector.load %arg4[%c0_8, %c0_9, %c0_10] : memref<12x1x8xf32, #tpu.memory_space<vmem>>, vector<12x1x8xf32>
    %9 = vector.broadcast %8 : vector<12x1x8xf32> to vector<12x8x8xf32>
    %10 = arith.addf %7, %9 : vector<12x8x8xf32>
    %11 = vector.extract_strided_slice %10 {offsets = [0, 0, 0], sizes = [4, 8, 8], strides = [1, 1, 1]} : vector<12x8x8xf32> to vector<4x8x8xf32>
    %cst_11 = arith.constant 0.353553385 : f32
    %12 = vector.broadcast %cst_11 : f32 to vector<4x8x8xf32>
    %13 = arith.mulf %11, %12 : vector<4x8x8xf32>
    %14 = vector.extract_strided_slice %10 {offsets = [4, 0, 0], sizes = [4, 8, 8], strides = [1, 1, 1]} : vector<12x8x8xf32> to vector<4x8x8xf32>
    %15 = vector.extract_strided_slice %10 {offsets = [8, 0, 0], sizes = [4, 8, 8], strides = [1, 1, 1]} : vector<12x8x8xf32> to vector<4x8x8xf32>
    "tpu.trace_start"() <{level = 10 : i32, message = "hsk,htk->hst"}> : () -> ()
    %cst_12 = arith.constant dense<0.000000e+00> : vector<4x8x8xf32>
    %16 = tpu.matmul %13, %14, %cst_12 {dimension_numbers = #tpu.dot_dimension_numbers<[2], [2], [1], [1], [0, 0, 0, 1, 1, 1], [0], [0]>} : vector<4x8x8xf32>, vector<4x8x8xf32>, vector<4x8x8xf32> -> vector<4x8x8xf32>
    "tpu.trace_stop"() : () -> ()
    %cst_13 = arith.constant dense<0xFF800000> : vector<4x8xf32>
    %17 = vector.multi_reduction <maximumf>, %16, %cst_13 [2] : vector<4x8x8xf32> to vector<4x8xf32>
    %18 = vector.shape_cast %17 : vector<4x8xf32> to vector<4x8x1xf32>
    %19 = vector.broadcast %18 : vector<4x8x1xf32> to vector<4x8x8xf32>
    %20 = arith.subf %16, %19 : vector<4x8x8xf32>
    %21 = math.exp %20 : vector<4x8x8xf32>
    %cst_14 = arith.constant dense<0.000000e+00> : vector<4x8xf32>
    %22 = vector.multi_reduction <add>, %21, %cst_14 [2] : vector<4x8x8xf32> to vector<4x8xf32>
    %23 = vector.shape_cast %22 : vector<4x8xf32> to vector<4x8x1xf32>
    %24 = tpu.reciprocal %23 {approx = true} : vector<4x8x1xf32> -> vector<4x8x1xf32>
    %25 = vector.broadcast %24 : vector<4x8x1xf32> to vector<4x8x8xf32>
    %26 = arith.mulf %21, %25 : vector<4x8x8xf32>
    %c0_15 = arith.constant 0 : index
    %c0_16 = arith.constant 0 : index
    %c0_17 = arith.constant 0 : index
    %c0_18 = arith.constant 0 : index
    %27 = vector.load %arg17[%c0_15, %c0_16, %c0_17, %c0_18] : memref<1x4x8x8xf32, #tpu.memory_space<vmem>>, vector<1x4x8x8xf32>
    %28 = vector.shape_cast %27 : vector<1x4x8x8xf32> to vector<4x8x8xf32>
    %29 = vector.shape_cast %26 : vector<4x8x8xf32> to vector<1x4x8x8xf32>
    tpu.vector_store %arg17[%c0_15, %c0_16, %c0_17, %c0_18], %29 {strides = array<i32>} : memref<1x4x8x8xf32, #tpu.memory_space<vmem>>, vector<1x4x8x8xf32>,
    "tpu.trace_start"() <{level = 10 : i32, message = "hst,htk->hsk"}> : () -> ()
    %cst_19 = arith.constant dense<0.000000e+00> : vector<4x8x8xf32>
    %30 = tpu.matmul %26, %15, %cst_19 {dimension_numbers = #tpu.dot_dimension_numbers<[2], [1], [1], [2], [0, 0, 0, 1, 1, 2], [0], [0]>} : vector<4x8x8xf32>, vector<4x8x8xf32>, vector<4x8x8xf32> -> vector<4x8x8xf32>
    "tpu.trace_stop"() : () -> ()
    %c0_20 = arith.constant 0 : index
    %c0_21 = arith.constant 0 : index
    %c0_22 = arith.constant 0 : index
    %31 = vector.load %arg5[%c0_20, %c0_21, %c0_22] : memref<4x8x32xf32, #tpu.memory_space<vmem>>, vector<4x8x32xf32>
    "tpu.trace_start"() <{level = 10 : i32, message = "hsk,hkd->hsd"}> : () -> ()
    %cst_23 = arith.constant dense<0.000000e+00> : vector<4x8x32xf32>
    %32 = tpu.matmul %30, %31, %cst_23 {dimension_numbers = #tpu.dot_dimension_numbers<[2], [1], [1], [2], [0, 0, 0, 1, 1, 2], [0], [0]>} : vector<4x8x8xf32>, vector<4x8x32xf32>, vector<4x8x32xf32> -> vector<4x8x32xf32>
    "tpu.trace_stop"() : () -> ()
    %cst_24 = arith.constant dense<0.000000e+00> : vector<8x32xf32>
    %33 = vector.multi_reduction <add>, %32, %cst_24 [0] : vector<4x8x32xf32> to vector<8x32xf32>
    %c0_25 = arith.constant 0 : index
    %c0_26 = arith.constant 0 : index
    %34 = vector.load %arg6[%c0_25, %c0_26] : memref<1x32xf32, #tpu.memory_space<vmem>>, vector<1x32xf32>
    %35 = vector.shape_cast %34 : vector<1x32xf32> to vector<32xf32>
    %36 = vector.shape_cast %35 : vector<32xf32> to vector<1x32xf32>
    %37 = vector.broadcast %36 : vector<1x32xf32> to vector<8x32xf32>
    %38 = arith.addf %33, %37 : vector<8x32xf32>
    %39 = arith.addf %1, %38 : vector<8x32xf32>
    %40 = arith.addf %3, %38 : vector<8x32xf32>
    %c0_27 = arith.constant 0 : index
    %c0_28 = arith.constant 0 : index
    %41 = vector.load %arg11[%c0_27, %c0_28] : memref<1x32xf32, #tpu.memory_space<vmem>>, vector<1x32xf32>
    %42 = vector.shape_cast %41 : vector<1x32xf32> to vector<32xf32>
    %c0_29 = arith.constant 0 : index
    %c0_30 = arith.constant 0 : index
    %43 = vector.load %arg12[%c0_29, %c0_30] : memref<1x32xf32, #tpu.memory_space<vmem>>, vector<1x32xf32>
    %44 = vector.shape_cast %43 : vector<1x32xf32> to vector<32xf32>
    %cst_31 = arith.constant dense<0.000000e+00> : vector<8xf32>
    %45 = vector.multi_reduction <add>, %39, %cst_31 [1] : vector<8x32xf32> to vector<8xf32>
    %46 = vector.shape_cast %45 : vector<8xf32> to vector<8x1xf32>
    %cst_32 = arith.constant 3.200000e+01 : f32
    %47 = vector.broadcast %cst_32 : f32 to vector<8x1xf32>
    %48 = arith.divf %46, %47 : vector<8x1xf32>
    %49 = vector.broadcast %48 : vector<8x1xf32> to vector<8x32xf32>
    %50 = arith.subf %39, %49 : vector<8x32xf32>
    %51 = arith.mulf %50, %50 : vector<8x32xf32>
    %cst_33 = arith.constant dense<0.000000e+00> : vector<8xf32>
    %52 = vector.multi_reduction <add>, %51, %cst_33 [1] : vector<8x32xf32> to vector<8xf32>
    %53 = vector.shape_cast %52 : vector<8xf32> to vector<8x1xf32>
    %cst_34 = arith.constant 3.200000e+01 : f32
    %54 = vector.broadcast %cst_34 : f32 to vector<8x1xf32>
    %55 = arith.divf %53, %54 : vector<8x1xf32>
    %56 = vector.broadcast %48 : vector<8x1xf32> to vector<8x32xf32>
    %57 = arith.subf %39, %56 : vector<8x32xf32>
    %cst_35 = arith.constant 9.99999974E-6 : f32
    %58 = vector.broadcast %cst_35 : f32 to vector<8x1xf32>
    %59 = arith.addf %55, %58 : vector<8x1xf32>
    %60 = math.rsqrt %59 : vector<8x1xf32>
    %61 = vector.broadcast %60 : vector<8x1xf32> to vector<8x32xf32>
    %62 = arith.mulf %57, %61 : vector<8x32xf32>
    %63 = vector.shape_cast %42 : vector<32xf32> to vector<1x32xf32>
    %64 = vector.broadcast %63 : vector<1x32xf32> to vector<8x32xf32>
    %65 = arith.mulf %62, %64 : vector<8x32xf32>
    %66 = vector.shape_cast %44 : vector<32xf32> to vector<1x32xf32>
    %67 = vector.broadcast %66 : vector<1x32xf32> to vector<8x32xf32>
    %68 = arith.addf %65, %67 : vector<8x32xf32>
    %c0_36 = arith.constant 0 : index
    %c0_37 = arith.constant 0 : index
    %69 = vector.load %arg7[%c0_36, %c0_37] : memref<32x128xf32, #tpu.memory_space<vmem>>, vector<32x128xf32>
    %cst_38 = arith.constant dense<0.000000e+00> : vector<8x128xf32>
    %70 = tpu.matmul %68, %69, %cst_38 {dimension_numbers = #tpu.dot_dimension_numbers<[1], [0], [0], [1], [0, 0, 1, 1], [], []>} : vector<8x32xf32>, vector<32x128xf32>, vector<8x128xf32> -> vector<8x128xf32>
    %c0_39 = arith.constant 0 : index
    %c0_40 = arith.constant 0 : index
    %71 = vector.load %arg8[%c0_39, %c0_40] : memref<1x128xf32, #tpu.memory_space<vmem>>, vector<1x128xf32>
    %72 = vector.shape_cast %71 : vector<1x128xf32> to vector<128xf32>
    %73 = vector.shape_cast %72 : vector<128xf32> to vector<1x128xf32>
    %74 = vector.broadcast %73 : vector<1x128xf32> to vector<8x128xf32>
    %75 = arith.addf %70, %74 : vector<8x128xf32>
    %76 = arith.mulf %75, %75 : vector<8x128xf32>
    %77 = arith.mulf %75, %76 : vector<8x128xf32>
    %cst_41 = arith.constant 4.471500e-02 : f32
    %78 = vector.broadcast %cst_41 : f32 to vector<8x128xf32>
    %79 = arith.mulf %78, %77 : vector<8x128xf32>
    %80 = arith.addf %75, %79 : vector<8x128xf32>
    %cst_42 = arith.constant 0.797884583 : f32
    %81 = vector.broadcast %cst_42 : f32 to vector<8x128xf32>
    %82 = arith.mulf %81, %80 : vector<8x128xf32>
    %83 = math.tanh %82 : vector<8x128xf32>
    %cst_43 = arith.constant 1.000000e+00 : f32
    %84 = vector.broadcast %cst_43 : f32 to vector<8x128xf32>
    %85 = arith.addf %84, %83 : vector<8x128xf32>
    %cst_44 = arith.constant 5.000000e-01 : f32
    %86 = vector.broadcast %cst_44 : f32 to vector<8x128xf32>
    %87 = arith.mulf %86, %85 : vector<8x128xf32>
    %88 = arith.mulf %75, %87 : vector<8x128xf32>
    %c0_45 = arith.constant 0 : index
    %c0_46 = arith.constant 0 : index
    %89 = vector.load %arg9[%c0_45, %c0_46] : memref<128x32xf32, #tpu.memory_space<vmem>>, vector<128x32xf32>
    %cst_47 = arith.constant dense<0.000000e+00> : vector<8x32xf32>
    %90 = tpu.matmul %88, %89, %cst_47 {dimension_numbers = #tpu.dot_dimension_numbers<[1], [0], [0], [1], [0, 0, 1, 1], [], []>} : vector<8x128xf32>, vector<128x32xf32>, vector<8x32xf32> -> vector<8x32xf32>
    %c0_48 = arith.constant 0 : index
    %c0_49 = arith.constant 0 : index
    %91 = vector.load %arg10[%c0_48, %c0_49] : memref<1x32xf32, #tpu.memory_space<vmem>>, vector<1x32xf32>
    %92 = vector.shape_cast %91 : vector<1x32xf32> to vector<32xf32>
    %93 = vector.shape_cast %92 : vector<32xf32> to vector<1x32xf32>
    %94 = vector.broadcast %93 : vector<1x32xf32> to vector<8x32xf32>
    %95 = arith.addf %90, %94 : vector<8x32xf32>
    %96 = arith.addf %68, %95 : vector<8x32xf32>
    %97 = arith.addf %40, %95 : vector<8x32xf32>
    %c0_50 = arith.constant 0 : index
    %c0_51 = arith.constant 0 : index
    %c0_52 = arith.constant 0 : index
    %98 = vector.load %arg16[%c0_50, %c0_51, %c0_52] : memref<1x8x32xf32, #tpu.memory_space<vmem>>, vector<1x8x32xf32>
    %99 = vector.shape_cast %98 : vector<1x8x32xf32> to vector<8x32xf32>
    %100 = vector.shape_cast %97 : vector<8x32xf32> to vector<1x8x32xf32>
    tpu.vector_store %arg16[%c0_50, %c0_51, %c0_52], %100 {strides = array<i32>} : memref<1x8x32xf32, #tpu.memory_space<vmem>>, vector<1x8x32xf32>,
    %c0_53 = arith.constant 0 : index
    %c0_54 = arith.constant 0 : index
    %101 = vector.load %arg13[%c0_53, %c0_54] : memref<1x32xf32, #tpu.memory_space<vmem>>, vector<1x32xf32>
    %102 = vector.shape_cast %101 : vector<1x32xf32> to vector<32xf32>
    %c0_55 = arith.constant 0 : index
    %c0_56 = arith.constant 0 : index
    %103 = vector.load %arg14[%c0_55, %c0_56] : memref<1x32xf32, #tpu.memory_space<vmem>>, vector<1x32xf32>
    %104 = vector.shape_cast %103 : vector<1x32xf32> to vector<32xf32>
    %cst_57 = arith.constant dense<0.000000e+00> : vector<8xf32>
    %105 = vector.multi_reduction <add>, %96, %cst_57 [1] : vector<8x32xf32> to vector<8xf32>
    %106 = vector.shape_cast %105 : vector<8xf32> to vector<8x1xf32>
    %cst_58 = arith.constant 3.200000e+01 : f32
    %107 = vector.broadcast %cst_58 : f32 to vector<8x1xf32>
    %108 = arith.divf %106, %107 : vector<8x1xf32>
    %109 = vector.broadcast %108 : vector<8x1xf32> to vector<8x32xf32>
    %110 = arith.subf %96, %109 : vector<8x32xf32>
    %111 = arith.mulf %110, %110 : vector<8x32xf32>
    %cst_59 = arith.constant dense<0.000000e+00> : vector<8xf32>
    %112 = vector.multi_reduction <add>, %111, %cst_59 [1] : vector<8x32xf32> to vector<8xf32>
    %113 = vector.shape_cast %112 : vector<8xf32> to vector<8x1xf32>
    %cst_60 = arith.constant 3.200000e+01 : f32
    %114 = vector.broadcast %cst_60 : f32 to vector<8x1xf32>
    %115 = arith.divf %113, %114 : vector<8x1xf32>
    %116 = vector.broadcast %108 : vector<8x1xf32> to vector<8x32xf32>
    %117 = arith.subf %96, %116 : vector<8x32xf32>
    %cst_61 = arith.constant 9.99999974E-6 : f32
    %118 = vector.broadcast %cst_61 : f32 to vector<8x1xf32>
    %119 = arith.addf %115, %118 : vector<8x1xf32>
    %120 = math.rsqrt %119 : vector<8x1xf32>
    %121 = vector.broadcast %120 : vector<8x1xf32> to vector<8x32xf32>
    %122 = arith.mulf %117, %121 : vector<8x32xf32>
    %123 = vector.shape_cast %102 : vector<32xf32> to vector<1x32xf32>
    %124 = vector.broadcast %123 : vector<1x32xf32> to vector<8x32xf32>
    %125 = arith.mulf %122, %124 : vector<8x32xf32>
    %126 = vector.shape_cast %104 : vector<32xf32> to vector<1x32xf32>
    %127 = vector.broadcast %126 : vector<1x32xf32> to vector<8x32xf32>
    %128 = arith.addf %125, %127 : vector<8x32xf32>
    %c0_62 = arith.constant 0 : index
    %c0_63 = arith.constant 0 : index
    %c0_64 = arith.constant 0 : index
    %129 = vector.load %arg15[%c0_62, %c0_63, %c0_64] : memref<1x8x32xf32, #tpu.memory_space<vmem>>, vector<1x8x32xf32>
    %130 = vector.shape_cast %129 : vector<1x8x32xf32> to vector<8x32xf32>
    %131 = vector.shape_cast %128 : vector<8x32xf32> to vector<1x8x32xf32>
    tpu.vector_store %arg15[%c0_62, %c0_63, %c0_64], %131 {strides = array<i32>} : memref<1x8x32xf32, #tpu.memory_space<vmem>>, vector<1x8x32xf32>,
    return
  }
  func.func @transform_0(%arg0: i32) -> (i32, i32, i32) {
    %c0_i32 = arith.constant 0 : i32
    %c0_i32_0 = arith.constant 0 : i32
    %c0_i32_1 = arith.constant 0 : i32
    return %arg0, %c0_i32, %c0_i32_0 : i32, i32, i32
  }
  func.func @transform_1(%arg0: i32) -> (i32, i32, i32) {
    %c0_i32 = arith.constant 0 : i32
    %c0_i32_0 = arith.constant 0 : i32
    %c0_i32_1 = arith.constant 0 : i32
    return %arg0, %c0_i32, %c0_i32_0 : i32, i32, i32
  }
  func.func @transform_2(%arg0: i32) -> (i32, i32, i32) {
    %c0_i32 = arith.constant 0 : i32
    %c0_i32_0 = arith.constant 0 : i32
    %c0_i32_1 = arith.constant 0 : i32
    %c0_i32_2 = arith.constant 0 : i32
    return %c0_i32, %c0_i32_0, %c0_i32_1 : i32, i32, i32
  }
  func.func @transform_3(%arg0: i32) -> (i32, i32, i32) {
    %c0_i32 = arith.constant 0 : i32
    %c0_i32_0 = arith.constant 0 : i32
    %c0_i32_1 = arith.constant 0 : i32
    %c0_i32_2 = arith.constant 0 : i32
    return %c0_i32, %c0_i32_0, %c0_i32_1 : i32, i32, i32
  }
  func.func @transform_4(%arg0: i32) -> (i32, i32, i32) {
    %c0_i32 = arith.constant 0 : i32
    %c0_i32_0 = arith.constant 0 : i32
    %c0_i32_1 = arith.constant 0 : i32
    %c0_i32_2 = arith.constant 0 : i32
    return %c0_i32, %c0_i32_0, %c0_i32_1 : i32, i32, i32
  }
  func.func @transform_5(%arg0: i32) -> (i32, i32) {
    %c0_i32 = arith.constant 0 : i32
    %c0_i32_0 = arith.constant 0 : i32
    %c0_i32_1 = arith.constant 0 : i32
    return %c0_i32, %c0_i32_0 : i32, i32
  }
  func.func @transform_6(%arg0: i32) -> (i32, i32) {
    %c0_i32 = arith.constant 0 : i32
    %c0_i32_0 = arith.constant 0 : i32
    %c0_i32_1 = arith.constant 0 : i32
    return %c0_i32, %c0_i32_0 : i32, i32
  }
  func.func @transform_7(%arg0: i32) -> (i32, i32) {
    %c0_i32 = arith.constant 0 : i32
    %c0_i32_0 = arith.constant 0 : i32
    %c0_i32_1 = arith.constant 0 : i32
    return %c0_i32, %c0_i32_0 : i32, i32
  }
  func.func @transform_8(%arg0: i32) -> (i32, i32) {
    %c0_i32 = arith.constant 0 : i32
    %c0_i32_0 = arith.constant 0 : i32
    %c0_i32_1 = arith.constant 0 : i32
    return %c0_i32, %c0_i32_0 : i32, i32
  }
  func.func @transform_9(%arg0: i32) -> (i32, i32) {
    %c0_i32 = arith.constant 0 : i32
    %c0_i32_0 = arith.constant 0 : i32
    %c0_i32_1 = arith.constant 0 : i32
    return %c0_i32, %c0_i32_0 : i32, i32
  }
  func.func @transform_10(%arg0: i32) -> (i32, i32) {
    %c0_i32 = arith.constant 0 : i32
    %c0_i32_0 = arith.constant 0 : i32
    %c0_i32_1 = arith.constant 0 : i32
    return %c0_i32, %c0_i32_0 : i32, i32
  }
  func.func @transform_11(%arg0: i32) -> (i32, i32) {
    %c0_i32 = arith.constant 0 : i32
    %c0_i32_0 = arith.constant 0 : i32
    %c0_i32_1 = arith.constant 0 : i32
    return %c0_i32, %c0_i32_0 : i32, i32
  }
  func.func @transform_12(%arg0: i32) -> (i32, i32) {
    %c0_i32 = arith.constant 0 : i32
    %c0_i32_0 = arith.constant 0 : i32
    %c0_i32_1 = arith.constant 0 : i32
    return %c0_i32, %c0_i32_0 : i32, i32
  }
  func.func @transform_13(%arg0: i32) -> (i32, i32) {
    %c0_i32 = arith.constant 0 : i32
    %c0_i32_0 = arith.constant 0 : i32
    %c0_i32_1 = arith.constant 0 : i32
    return %c0_i32, %c0_i32_0 : i32, i32
  }
  func.func @transform_14(%arg0: i32) -> (i32, i32, i32) {
    %c0_i32 = arith.constant 0 : i32
    %c0_i32_0 = arith.constant 0 : i32
    %c0_i32_1 = arith.constant 0 : i32
    return %arg0, %c0_i32, %c0_i32_0 : i32, i32, i32
  }
  func.func @transform_15(%arg0: i32) -> (i32, i32, i32) {
    %c0_i32 = arith.constant 0 : i32
    %c0_i32_0 = arith.constant 0 : i32
    %c0_i32_1 = arith.constant 0 : i32
    return %arg0, %c0_i32, %c0_i32_0 : i32, i32, i32
  }
  func.func @transform_16(%arg0: i32) -> (i32, i32, i32, i32) {
    %c0_i32 = arith.constant 0 : i32
    %c0_i32_0 = arith.constant 0 : i32
    %c0_i32_1 = arith.constant 0 : i32
    %c0_i32_2 = arith.constant 0 : i32
    return %arg0, %c0_i32, %c0_i32_0, %c0_i32_1 : i32, i32, i32, i32
  }
}

</mosaic_0001>

<bundles_post_ra>
// kernel: transformer_layer.1
= control target key start
LH: loop header
LB: loop body
LE: loop exit
PB: predicated region body
PF: predicated region fallthrough
CT: control target
= control target key end

     0   :  { %s4379_s0 = inlined_call_operand.vmem [shape: f32[2,8,32], index: 0, kind: input, shape index: {}, may-alias: {0,1}]   ;;  %s4380_s1 = inlined_call_operand.vmem [shape: f32[2,8,32], index: 1, kind: input, shape index: {}, may-alias: {0,1}]   ;;  %s4381_s2 = inlined_call_operand.vmem [shape: f32[12,32,8], index: 2, kind: input, shape index: {}]   ;;  %s4382_s3 = inlined_call_operand.vmem [shape: f32[12,1,8], index: 3, kind: input, shape index: {}]   ;;  %s4383_s4 = inlined_call_operand.vmem [shape: f32[4,8,32], index: 4, kind: input, shape index: {}]   ;;  %s4384_s5 = inlined_call_operand.vmem [shape: f32[1,32], index: 5, kind: input, shape index: {}]   ;;  %s4385_s6 = inlined_call_operand.vmem [shape: f32[32,128], index: 6, kind: input, shape index: {}]   ;;  %s4386_s7 = inlined_call_operand.vmem [shape: f32[1,128], index: 7, kind: input, shape index: {}]   ;;  %s4387_s8 = inlined_call_operand.vmem [shape: f32[128,32], index: 8, kind: input, shape index: {}]   ;;  %s4388_s9 = inlined_call_operand.vmem [shape: f32[1,32], index: 9, kind: input, shape index: {}]   ;;  %s4389_s10 = inlined_call_operand.vmem [shape: f32[1,32], index: 10, kind: input, shape index: {}]   ;;  %s4390_s11 = inlined_call_operand.vmem [shape: f32[1,32], index: 11, kind: input, shape index: {}]   ;;  %s4391_s12 = inlined_call_operand.vmem [shape: f32[1,32], index: 12, kind: input, shape index: {}]   ;;  %s4392_s13 = inlined_call_operand.vmem [shape: f32[1,32], index: 13, kind: input, shape index: {}]   ;;  %s4393_s14 = inlined_call_operand.hbm [shape: f32[2,8,32], index: 14, kind: output, shape index: {0}]   ;;  %s4394_s15 = inlined_call_operand.hbm [shape: f32[2,8,32], index: 15, kind: output, shape index: {1}]   ;;  %s4395_s16 = inlined_call_operand.hbm [shape: f32[2,4,8,8], index: 16, kind: output, shape index: {2}]  }
   0x1   :  { %4407 = sst [smem:[#allocation15_spill]] %s4379_s0 }
   0x2   :  { %4408 = sst [smem:[#allocation16_spill]] %s4380_s1 }
   0x3   :  { %4409 = sst [smem:[#allocation17_spill]] %s4381_s2 }
   0x4   :  { %22 = vsyncpa [#allocation3], 0 }
   0x5   :  { %24 = vsyncpa [#allocation3 + $0x1], 0 }
   0x6   :  { %25 = vsyncpa [#allocation5], 0 }
   0x7   :  { %27 = vsyncpa [#allocation5 + $0x1], 0  ;;  %s3732_s21 = smov 0   ;;  %s3734_s22 = smov 0  }
   0x8   :  { %s3736_s23 = smov 0   ;;  %s3738_s24 = smov 0  }
   0x9 LB: > { %4410 = sst [smem:[#allocation9_spill]] %s3625_s21  ;;  %s3753_s25 = sadd.s32 4294967295, %s3637_s24   ;;  %s3637_s24 = sphi %s3738_s24, %s4428_s24   ;;  %s3633_s23 = sphi %s3736_s23, %s4430_s23   ;;  %s3629_s22 = sphi %s3734_s22, %s4432_s22   ;;  %s3625_s21 = sphi %s3732_s21, %s4431_s21  }
   0xa   : > { %4411 = sst [smem:[#allocation10_spill]] %s3633_s23  ;;  %s4396_s26 = sadd.s32 4294967294, %s3637_s24  }
   0xb   : > { %4412 = sst [smem:[#allocation11_spill]] %s3637_s24  ;;  %s3757_s27 = sadd.s32 1, %s3637_s24  }
   0xc   : > { %4413 = sst [smem:[#allocation12_spill]] %s3757_s27  ;;  %s344_s28 = sadd.s32 1, %s3633_s23 }
   0xd   : > { %s341_s29 = ssub.s32 %s3637_s24, %s3757_s27  ;;  %p354_p0 = scmp.ne.s32.totalorder %s3633_s23, %s3629_s22 }
   0xe   : > { %p342_p1 = scmp.eq.s32.totalorder %s341_s29, 0  ;;  %p355_p2 = scmp.eq.s32.totalorder %s3753_s25, 1 }
   0xf   : > { %p360_p3 = scmp.ne.s32.totalorder %s3629_s22, %s3625_s21  ;;  %p361_p4 = scmp.eq.s32.totalorder %s4396_s26, 1 }
  0x10   : > { %s3770_s30 = scalar_select %p342_p1, %s3633_s23, %s344_s28  }
  0x11   : > { %p3772_p5 = por %p355_p2, %p354_p0  ;;  %p3776_p6 = por %p361_p4, %p360_p3 }
  0x12   : > { %4414 = sst [smem:[#allocation13_spill]] %s3770_s30  ;;  %p2929_p7 = scmp.ge.s32.totalorder %s3637_s24, 1 }
  0x13   : > { %s4416_s17 = scalar_select %p3776_p6, 1, 0 }
  0x14   : > { %p481_p8 = scmp.lt.s32.totalorder %s3637_s24, 3 }
  0x15   : > { %4417 = sst [smem:[#allocation14_spill]] %s4416_s17 }
  0x16   : > { %p482_p9 = pnand %p2929_p7, %p481_p8 }
  0x17   : > { %s4418_s2 = sld [smem:[#allocation17_spill]] (!%p482_p9)  ;;  %v3639_v3 = vmov (!%p482_p9), 0.0|0.0   ;;  %p544_p10 = scmp.lt.s32.totalorder (!%p482_p9), %s3753_s25, 1  ;;  %vm3640_vm0 = vmmov (!%p482_p9), 0   ;;  %v3641_v9 = vmov (!%p482_p9), 0.0   ;;  %vm686_vm1 = vcmask (!%p482_p9), 261120  }
  0x18   : > { %485 = sbr.rel (%p482_p9) target bundleno = 2346 (0x92a), region = 76  ;;  %3337 = vmatprep.subr.bf16.mxu0 (!%p482_p9), %v3639_v3  ;;  %3355 = vmatprep.subr.bf16.mxu1 (!%p482_p9), %v3639_v3  ;;  %s4419_s19 = sld [smem:[#allocation15_spill]] (!%p482_p9)  ;;  %vm1534_vm2 = vcmask (!%p482_p9), 64512  }
  0x19   : > { %3107 = vmatprep.mubr.msk.f32.mxu0 (!%p482_p9), %vm3640_vm0, %v3641_v9  ;;  %3140 = vmatprep.mubr.msk.f32.mxu1 (!%p482_p9), %vm3640_vm0, %v3641_v9  ;;  %s4079_s27 = sand.u32 (!%p482_p9), 1, %s3629_s22   ;;  %s4421_s1 = sld [smem:[#allocation16_spill]] (!%p482_p9) }
  0x1a   : > { %s2932_s17 = sshll.u32 (!%p482_p9), %s4079_s27, 5  ;;  %s2746_s28 = sand.u32 (!%p482_p9), 1, %s3753_s25  }
  0x1b   : > { %s4406_s26 = sshll.u32 (!%p482_p9), %s3753_s25, 7 }
  0x1c   : > { %s4258_s24 = scalar_lea.hbm (!%p482_p9), %s4394_s15, %s4406_s26 }
  0x1d   : > { %v554_v0 = vld [vmem:[%s4418_s2] sm:$0xff] (!%p482_p9)  ;;  %v555_v1 = vld [vmem:[%s4418_s2 + $0x8] sm:$0xff] (!%p482_p9)  ;;  %v556_v6 = vld [vmem:[%s4418_s2 + $0x10] sm:$0xff] (!%p482_p9) }
  0x1e   : > { %v566_v2 = vld [vmem:[%s4418_s2 + $0x60] sm:$0xff] (!%p482_p9)  ;;  %v3338_v4 = vpack.c.bf16 (!%p482_p9), %v555_v1, %v554_v0  ;;  %v567_v5 = vld [vmem:[%s4418_s2 + $0x68] sm:$0xff] (!%p482_p9)  ;;  %v557_v7 = vld [vmem:[%s4418_s2 + $0x18] sm:$0xff] (!%p482_p9) }
  0x1f   : > { %v3356_v8 = vpack.c.bf16 %v567_v5, %v566_v2  ;;  %v568_v10 = vld [vmem:[%s4418_s2 + $0x70] sm:$0xff]  ;;  %v569_v11 = vld [vmem:[%s4418_s2 + $0x78] sm:$0xff]  ;;  %v3341_v12 = vpack.c.bf16 %v557_v7, %v556_v6  ;;  %s3814_s18 = scalar_select %p544_p10, %s3753_s25, 1  ;;  %v558_v14 = vld [vmem:[%s4418_s2 + $0x20] sm:$0xff] }
  0x20   : > { %3339 = vmatpush3.bf16.msra.mxu0 %v3338_v4  ;;  %v3359_v13 = vpack.c.bf16 %v569_v11, %v568_v10  ;;  %v559_v15 = vld [vmem:[%s4418_s2 + $0x28] sm:$0xff]  ;;  %v574_v16 = vld [vmem:[%s4418_s2 + $0xa0] sm:$0xff]  ;;  %v560_v21 = vld [vmem:[%s4418_s2 + $0x30] sm:$0xff] }
  0x21   : > { %3340 = vmatprep.subr.bf16.mxu0 %v3639_v3  ;;  %3357 = vmatpush3.bf16.msra.mxu1 %v3356_v8  ;;  %s4404_s29 = sshll.u32 %s3814_s18, 3  ;;  %v575_v17 = vld [vmem:[%s4418_s2 + $0xa8] sm:$0xff]  ;;  %v3344_v19 = vpack.c.bf16 %v559_v15, %v558_v14  ;;  %v561_v22 = vld [vmem:[%s4418_s2 + $0x38] sm:$0xff]  ;;  %v576_v23 = vld [vmem:[%s4418_s2 + $0xb0] sm:$0xff]  ;;  %s4420_s21 = sshll.u32 %s3814_s18, 3 }
  0x22   : > { %3358 = vmatprep.subr.bf16.mxu1 %v3639_v3  ;;  %s547_s20 = scalar_lea.vmem %s4419_s19, %s4404_s29  ;;  %v3368_v20 = vpack.c.bf16 %v575_v17, %v574_v16  ;;  %v577_v24 = vld [vmem:[%s4418_s2 + $0xb8] sm:$0xff]  ;;  %v3347_v25 = vpack.c.bf16 %v561_v22, %v560_v21  ;;  %v562_v27 = vld [vmem:[%s4418_s2 + $0x40] sm:$0xff]  ;;  %v563_v28 = vld [vmem:[%s4418_s2 + $0x48] sm:$0xff]  ;;  %s4089_s19 = scalar_lea.vmem [#allocation6], %s2932_s17 }
  0x23   : > { %v3836_v18 = vld [vmem:[%s547_s20] sm:$0xff]  ;;  %v3371_v26 = vpack.c.bf16 %v577_v24, %v576_v23  ;;  %v583_v30 = vld [vmem:[%s4418_s2 + $0xe8] sm:$0xff]  ;;  %v3350_v31 = vpack.c.bf16 %v563_v28, %v562_v27  ;;  %v564_v33 = vld [vmem:[%s4418_s2 + $0x50] sm:$0xff]  ;;  %s551_s30 = scalar_lea.vmem %s4421_s1, %s4420_s21  ;;  %s4405_s20 = sshll.u32 %s4079_s27, 3 }
  0x24   : > { %3342 = vmatpush3.bf16.msra.mxu0 %v3341_v12  ;;  %v582_v29 = vld [vmem:[%s4418_s2 + $0xe0] sm:$0xff]  ;;  %v565_v34 = vld [vmem:[%s4418_s2 + $0x58] sm:$0xff]  ;;  %v584_v35 = vld [vmem:[%s4418_s2 + $0xf0] sm:$0xff]  ;;  %s536_s18 = scalar_lea.vmem [#allocation4], %s4405_s20  ;;  %s3642_s20 = smov [#allocation4]  }
  0x25   : > { %3343 = vmatprep.subr.bf16.mxu0 %v3639_v3  ;;  %3360 = vmatpush3.bf16.msra.mxu1 %v3359_v13  ;;  %v3380_v32 = vpack.c.bf16 %v583_v30, %v582_v29  ;;  %v585_v36 = vld [vmem:[%s4418_s2 + $0xf8] sm:$0xff]  ;;  %v3353_v37 = vpack.c.bf16 %v565_v34, %v564_v33  ;;  %v570_v39 = vld [vmem:[%s4418_s2 + $0x80] sm:$0xff]  ;;  %v571_v40 = vld [vmem:[%s4418_s2 + $0x88] sm:$0xff]  ;;  %s2778_s23 = sshll.u32 %s536_s18, 4  ;;  %s3519_s1 = sshll.u32 %s3642_s20, 4  ;;  %s4260_s23 = int_to_ptr.vmem [resolvable:$true] %s2778_s23  ;;  %s3520_s1 = int_to_ptr.vmem [resolvable:$false] %s3519_s1 }
  0x26   : > { %3367 = vmatprep.subr.bf16.mxu1 %v3639_v3  ;;  %v3383_v38 = vpack.c.bf16 %v585_v36, %v584_v35  ;;  %v3362_v41 = vpack.c.bf16 %v571_v40, %v570_v39  ;;  %v572_v42 = vld [vmem:[%s4418_s2 + $0x90] sm:$0xff]  ;;  %v573_v43 = vld [vmem:[%s4418_s2 + $0x98] sm:$0xff]  ;;  %v578_v45 = vld [vmem:[%s4418_s2 + $0xc0] sm:$0xff]  ;;  %s3515_s29 = scalar_lea.vmem %s4260_s23, 128  ;;  %s3521_s17 = scalar_lea.vmem %s3520_s1, 256 }
  0x27   : > { %3108 = vmatmul.mubr.msk.f32.vlgmr.msra.gmra.mrb[0].mxu0 %vm686_vm1, %v3836_v18  ;;  %v3365_v44 = vpack.c.bf16 %v573_v43, %v572_v42  ;;  %v579_v46 = vld [vmem:[%s4418_s2 + $0xc8] sm:$0xff]  ;;  %v580_v48 = vld [vmem:[%s4418_s2 + $0xd0] sm:$0xff]  ;;  %v581_v49 = vld [vmem:[%s4418_s2 + $0xd8] sm:$0xff]  ;;  %p3516_p11 = scmp.ne.s32.totalorder %s4260_s23, %s3515_s29  ;;  %p3522_p0 = scmp.lt.s32.totalorder %s4260_s23, %s3520_s1 }
  0x28   : > { %3345 = vmatpush3.bf16.msra.mxu0 %v3344_v19  ;;  %3141 = vmatmul.mubr.msk.f32.vlgmr.msra.gmra.mrb[0].mxu1 %vm686_vm1, %v3836_v18  ;;  %v3374_v47 = vpack.c.bf16 %v579_v46, %v578_v45  ;;  %v3377_v50 = vpack.c.bf16 %v581_v49, %v580_v48  ;;  %v590_v51 = vld [vmem:[%s4418_s2 + $0x120] sm:$0xff]  ;;  %v591_v52 = vld [vmem:[%s4418_s2 + $0x128] sm:$0xff]  ;;  %v592_v54 = vld [vmem:[%s4418_s2 + $0x130] sm:$0xff]  ;;  %p3523_p1 = scmp.lt.s32.totalorder %s3521_s17, %s3515_s29 }
  0x29   : > { %3346 = vmatprep.subr.bf16.mxu0 %v3639_v3  ;;  %3369 = vmatpush3.bf16.msra.mxu1 %v3368_v20  ;;  %v3392_v53 = vpack.c.bf16 %v591_v52, %v590_v51  ;;  %v593_v55 = vld [vmem:[%s4418_s2 + $0x138] sm:$0xff]  ;;  %v586_v57 = vld [vmem:[%s4418_s2 + $0x100] sm:$0xff]  ;;  %v587_v58 = vld [vmem:[%s4418_s2 + $0x108] sm:$0xff]  ;;  %p3517_p12 = pnand %p3516_p11, %p3772_p5 }
  0x2a   : > { %3118 = vmatprep.mubr.msk.f32.mxu0 %vm3640_vm0, %v3641_v9  ;;  %3370 = vmatprep.subr.bf16.mxu1 %v3639_v3  ;;  %v3395_v56 = vpack.c.bf16 %v593_v55, %v592_v54  ;;  %v3386_v59 = vpack.c.bf16 %v587_v58, %v586_v57  ;;  %v598_v60 = vld [vmem:[%s4418_s2 + $0x160] sm:$0xff]  ;;  %v599_v61 = vld [vmem:[%s4418_s2 + $0x168] sm:$0xff]  ;;  %v588_v63 = vld [vmem:[%s4418_s2 + $0x110] sm:$0xff]  ;;  %p3524_p2 = por %p3523_p1, %p3522_p0 }
  0x2b   : > { %3162 = vmatprep.mubr.msk.f32.mxu1 %vm3640_vm0, %v3641_v9  ;;  %v3404_v62 = vpack.c.bf16 %v599_v61, %v598_v60  ;;  %v589_v0 = vld [vmem:[%s4418_s2 + $0x118] sm:$0xff]  ;;  %v600_v2 = vld [vmem:[%s4418_s2 + $0x170] sm:$0xff]  ;;  %v594_v6 = vld [vmem:[%s4418_s2 + $0x140] sm:$0xff]  ;;  %p3518_p13 = pneg %p3517_p12 }
  0x2c   : > { %3348 = vmatpush3.bf16.msra.mxu0 %v3347_v25  ;;  %v3389_v1 = vpack.c.bf16 %v589_v0, %v588_v63  ;;  %v601_v4 = vld [vmem:[%s4418_s2 + $0x178] sm:$0xff]  ;;  %v595_v7 = vld [vmem:[%s4418_s2 + $0x148] sm:$0xff]  ;;  %v596_v10 = vld [vmem:[%s4418_s2 + $0x150] sm:$0xff] }
  0x2d   : > { %3349 = vmatprep.subr.bf16.mxu0 %v3639_v3  ;;  %3372 = vmatpush3.bf16.msra.mxu1 %v3371_v26  ;;  %v3407_v5 = vpack.c.bf16 %v601_v4, %v600_v2  ;;  %v3398_v8 = vpack.c.bf16 %v595_v7, %v594_v6  ;;  %v597_v11 = vld [vmem:[%s4418_s2 + $0x158] sm:$0xff]  ;;  %v2938_v22 = vld [vmem:[%s4382_s3 + $0x3] ss:$0 sm:$0xff]  ;;  %v2942_v24 = vld [vmem:[%s4382_s3 + $0x7] ss:$0 sm:$0xff]  ;;  %s4263_s2 = scalar_lea.sflag [#allocation5], %s2746_s28  ;;  %p3525_p3 = pnand %p3524_p2, %p3518_p13 }
  0x2e   : > { %3379 = vmatprep.subr.bf16.mxu1 %v3639_v3  ;;  %v3401_v12 = vpack.c.bf16 %v597_v11, %v596_v10  ;;  %v2940_v34 = vld [vmem:[%s4382_s3 + $0x5] ss:$0 sm:$0xff]  ;;  %v2936_v36 = vld [vmem:[%s4382_s3 + $0x1] ss:$0 sm:$0xff]  ;;  %v2937_v42 = vld [vmem:[%s4382_s3 + $0x2] ss:$0 sm:$0xff] }
  0x2f   : > { %3119 = vmatmul.mubr.msk.f32.vlgmr.msra.gmra.mrb[2].mxu0 %vm686_vm1, %v3836_v18  ;;  %v2941_v43 = vld [vmem:[%s4382_s3 + $0x6] ss:$0 sm:$0xff]  ;;  %v2943_v54 = vld [vmem:[%s4382_s3 + $0x8] ss:$0 sm:$0xff] }
  0x30   : > { %3351 = vmatpush3.bf16.msra.mxu0 %v3350_v31  ;;  %3163 = vmatmul.mubr.msk.f32.vlgmr.msra.gmra.mrb[2].mxu1 %vm686_vm1, %v3836_v18  ;;  %v2935_v31 = vld [vmem:[%s4382_s3] ss:$0 sm:$0xff] }
  0x31   : > { %3352 = vmatprep.subr.bf16.mxu0 %v3639_v3  ;;  %3381 = vmatpush3.bf16.msra.mxu1 %v3380_v32  ;;  %v2939_v32 = vld [vmem:[%s4382_s3 + $0x4] ss:$0 sm:$0xff] }
  0x32   : > { %3129 = vmatprep.mubr.msk.f32.mxu0 %vm3640_vm0, %v3641_v9  ;;  %3382 = vmatprep.subr.bf16.mxu1 %v3639_v3 }
  0x33   : > { %3184 = vmatprep.mubr.msk.f32.mxu1 %vm3640_vm0, %v3641_v9 }
  0x34   : > { %3354 = vmatpush3.bf16.msra.mxu0 %v3353_v37 }
  0x35   : > { %3361 = vmatprep.subr.bf16.mxu0 %v3639_v3  ;;  %3384 = vmatpush3.bf16.msra.mxu1 %v3383_v38 }
  0x36   : > { %3391 = vmatprep.subr.bf16.mxu1 %v3639_v3 }
  0x37   : > { %3130 = vmatmul.mubr.msk.f32.vlgmr.msra.gmra.mrb[4].mxu0 %vm686_vm1, %v3836_v18 }
  0x38   : > { %3363 = vmatpush3.bf16.msra.mxu0 %v3362_v41  ;;  %3185 = vmatmul.mubr.msk.f32.vlgmr.msra.gmra.mrb[4].mxu1 %vm686_vm1, %v3836_v18 }
  0x39   : > { %3364 = vmatprep.subr.bf16.mxu0 %v3639_v3  ;;  %3151 = vmatprep.mubr.msk.f32.mxu0 %vm3640_vm0, %v3641_v9 }
  0x3a   : > { %3206 = vmatprep.mubr.msk.f32.mxu1 %vm3640_vm0, %v3641_v9  ;;  %3393 = vmatpush3.bf16.msra.mxu1 %v3392_v53 }
  0x3b   : > { %3394 = vmatprep.subr.bf16.mxu1 %v3639_v3 }
  0x3c   : > { %3366 = vmatpush3.bf16.msra.mxu0 %v3365_v44 }
  0x3d   : > { %3373 = vmatprep.subr.bf16.mxu0 %v3639_v3 }
  0x3e   : > { %3396 = vmatpush3.bf16.msra.mxu1 %v3395_v56 }
  0x3f   : > { %3152 = vmatmul.mubr.msk.f32.vlgmr.msra.gmra.mrb[6].mxu0 %vm686_vm1, %v3836_v18  ;;  %3403 = vmatprep.subr.bf16.mxu1 %v3639_v3 }
  0x40   : > { %3375 = vmatpush3.bf16.msra.mxu0 %v3374_v47  ;;  %3173 = vmatprep.mubr.msk.f32.mxu0 %vm3640_vm0, %v3641_v9 }
  0x41   : > { %3376 = vmatprep.subr.bf16.mxu0 %v3639_v3  ;;  %3207 = vmatmul.mubr.msk.f32.vlgmr.msra.gmra.mrb[6].mxu1 %vm686_vm1, %v3836_v18 }
  0x42   : > { %3405 = vmatpush3.bf16.msra.mxu1 %v3404_v62  ;;  %3228 = vmatprep.mubr.msk.f32.mxu1 %vm3640_vm0, %v3641_v9 }
  0x43   : > { %3406 = vmatprep.subr.bf16.mxu1 %v3639_v3 }
  0x44   : > { %3378 = vmatpush3.bf16.msra.mxu0 %v3377_v50  ;;  %v2944_v50 = vld [vmem:[%s4382_s3 + $0x9] ss:$0 sm:$0xff] }
  0x45   : > { %3385 = vmatprep.subr.bf16.mxu0 %v3639_v3 }
  0x46   : > { %3408 = vmatpush3.bf16.msra.mxu1 %v3407_v5 }
  0x47   : > { %3174 = vmatmul.mubr.msk.f32.vlgmr.msra.gmra.mrb[8].mxu0 %vm686_vm1, %v3836_v18  ;;  %3246 = vmatprep.subr.mxu1 %v3641_v9 }
  0x48   : > { %3195 = vmatprep.mubr.msk.f32.mxu0 %vm3640_vm0, %v3641_v9  ;;  %3387 = vmatpush3.bf16.msra.mxu0 %v3386_v59 }
  0x49   : > { %3388 = vmatprep.subr.bf16.mxu0 %v3639_v3  ;;  %3229 = vmatmul.mubr.msk.f32.vlgmr.msra.gmra.mrb[8].mxu1 %vm686_vm1, %v3836_v18 }
  0x4a   : > { %3248 = vmatprep.mubr.msk.f32.mxu1 %vm3640_vm0, %v3641_v9 }
  0x4c   : > { %3390 = vmatpush3.bf16.msra.mxu0 %v3389_v1 }
  0x4d   : > { %3397 = vmatprep.subr.bf16.mxu0 %v3639_v3 }
  0x4f   : > { %3196 = vmatmul.mubr.msk.f32.vlgmr.msra.gmra.mrb[10].mxu0 %vm686_vm1, %v3836_v18 }
  0x50   : > { %3399 = vmatpush3.bf16.msra.mxu0 %v3398_v8  ;;  %3217 = vmatprep.mubr.msk.f32.mxu0 %vm3640_vm0, %v3641_v9 }
  0x51   : > { %3400 = vmatprep.subr.bf16.mxu0 %v3639_v3 }
  0x54   : > { %3402 = vmatpush3.bf16.msra.mxu0 %v3401_v12 }
  0x55   : > { %3231 = vmatprep.subr.mxu0 %v3641_v9 }
  0x57   : > { %3218 = vmatmul.mubr.msk.f32.vlgmr.msra.gmra.mrb[12].mxu0 %vm686_vm1, %v3836_v18 }
  0x58   : > { %3233 = vmatprep.mubr.msk.f32.mxu0 %vm3640_vm0, %v3641_v9 }
  0xfa   : > { %v756_v13 = vpop.f32.mrb[0].mxu0 }
  0xfb   : > { %v3109_v14 = vpop.f32.mrb[1].mxu0  ;;  %v966_v15 = vpop.f32.mrb[0].mxu1  ;;  %v757_v33 = vadd.f32 %v2935_v31, %v756_v13 }
  0xfc   : > { %v3142_v16 = vpop.f32.mrb[1].mxu1  ;;  %v967_v23 = vadd.f32 %v2938_v22, %v966_v15 }
  0xfd   : > { %v1530_v40 = vmul.f32 0.35355338, %v757_v33 }
  0xfe   : > { %v1533_v30 = vmul.f32 0.35355338, %v967_v23 }
 0x102   : > { %v826_v17 = vpop.f32.mrb[2].mxu0 }
 0x103   : > { %v3120_v19 = vpop.f32.mrb[3].mxu0  ;;  %v1106_v20 = vpop.f32.mrb[2].mxu1  ;;  %v827_v41 = vadd.f32 %v2936_v36, %v826_v17  ;;  %v2945_v36 = vld [vmem:[%s4382_s3 + $0xa] ss:$0 sm:$0xff] }
 0x104   : > { %v3164_v21 = vpop.f32.mrb[3].mxu1  ;;  %v1107_v39 = vadd.f32 %v2940_v34, %v1106_v20 }
 0x105   : > { %v1531_v44 = vmul.f32 0.35355338, %v827_v41  ;;  %v2946_v41 = vld [vmem:[%s4382_s3 + $0xb] ss:$0 sm:$0xff] }
 0x10a   : > { %v896_v25 = vpop.f32.mrb[4].mxu0 }
 0x10b   : > { %v3131_v26 = vpop.f32.mrb[5].mxu0  ;;  %v1246_v27 = vpop.f32.mrb[4].mxu1  ;;  %v897_v45 = vadd.f32 %v2937_v42, %v896_v25 }
 0x10c   : > { %v1247_v28 = vadd.f32 %v2942_v24, %v1246_v27  ;;  %v3186_v29 = vpop.f32.mrb[5].mxu1 }
 0x10d   : > { %v1532_v49 = vmul.f32 0.35355338, %v897_v45 }
 0x10e   : > { %3247 = vmatpush3.xpose.msk.msra.mxu1 %vm1534_vm2, %v1247_v28 }
 0x10f   : > { %3256 = vmatprep.subr.mxu1 %v3641_v9 }
 0x111   : > { %3249 = vmatmul.mubr.msk.f32.vlgmr.msra.gmra.mrb[10].mxu1 %vm1534_vm2, %v1533_v30 }
 0x112   : > { %v1036_v35 = vpop.f32.mrb[6].mxu0  ;;  %3258 = vmatprep.mubr.msk.f32.mxu1 %vm3640_vm0, %v3641_v9 }
 0x113   : > { %v1037_v37 = vadd.f32 %v2939_v32, %v1036_v35  ;;  %v3153_v38 = vpop.f32.mrb[7].mxu0 }
 0x114   : > { %v1386_v51 = vpop.f32.mrb[6].mxu1 }
 0x115   : > { %3232 = vmatpush3.xpose.msk.msra.mxu0 %vm1534_vm2, %v1037_v37  ;;  %v1387_v52 = vadd.f32 %v2944_v50, %v1386_v51  ;;  %v3208_v53 = vpop.f32.mrb[7].mxu1  ;;  %v2180_v50 = vld [vmem:[%s4383_s4 + $0x8] sm:$0xff]  ;;  %v2181_v51 = vld [vmem:[%s4383_s4 + $0x10] sm:$0xff] }
 0x116   : > { %3236 = vmatprep.subr.mxu0 %v3641_v9 }
 0x117   : > { %3257 = vmatpush3.msra.mxu1 %v1387_v52 }
 0x118   : > { %3234 = vmatmul.mubr.msk.f32.vlgmr.msra.gmra.mrb[14].mxu0 %vm1534_vm2, %v1530_v40  ;;  %3266 = vmatprep.subr.mxu1 %v3641_v9 }
 0x119   : > { %3237 = vmatpush3.xpose.msk.msra.mxu0 %vm1534_vm2, %v1107_v39  ;;  %3238 = vmatprep.mubr.msk.f32.mxu0 %vm3640_vm0, %v3641_v9 }
 0x11a   : > { %v1176_v46 = vpop.f32.mrb[8].mxu0  ;;  %3241 = vmatprep.subr.mxu0 %v3641_v9 }
 0x11b   : > { %v1177_v47 = vadd.f32 %v2941_v43, %v1176_v46  ;;  %v3175_v48 = vpop.f32.mrb[9].mxu0 }
 0x11c   : > { %3239 = vmatmul.mubr.msk.f32.vlgmr.msra.gmra.mrb[16].mxu0 %vm1534_vm2, %v1531_v44  ;;  %v4067_v58 = vpop.f32.mrb[8].mxu1 }
 0x11d   : > { %3242 = vmatpush3.xpose.msk.msra.mxu0 %vm1534_vm2, %v1177_v47  ;;  %3243 = vmatprep.mubr.msk.f32.mxu0 %vm3640_vm0, %v3641_v9  ;;  %v3230_v59 = vpop.f32.mrb[9].mxu1  ;;  %v1527_v44 = vadd.f32 %v2946_v41, %v4067_v58  ;;  %v2618_v41 = vld [vmem:[%s4387_s8 + $0x18] sm:$0xff] }
 0x11e   : > { %3251 = vmatprep.subr.mxu0 %v3641_v9 }
 0x120   : > { %3244 = vmatmul.mubr.msk.f32.vlgmr.msra.gmra.mrb[18].mxu0 %vm1534_vm2, %v1532_v49  ;;  %v2179_v49 = vld [vmem:[%s4383_s4] sm:$0xff] }
 0x121   : > { %3253 = vmatprep.mubr.msk.f32.mxu0 %vm3640_vm0, %v3641_v9 }
 0x122   : > { %v1316_v55 = vpop.f32.mrb[10].mxu0 }
 0x123   : > { %v1317_v56 = vadd.f32 %v2943_v54, %v1316_v55  ;;  %v3197_v57 = vpop.f32.mrb[11].mxu0  ;;  %v2182_v54 = vld [vmem:[%s4383_s4 + $0x18] sm:$0xff] }
 0x125   : > { %3252 = vmatpush3.msra.mxu0 %v1317_v56 }
 0x126   : > { %3261 = vmatprep.subr.mxu0 %v3641_v9 }
 0x12a   : > { %v1456_v60 = vpop.f32.mrb[12].mxu0 }
 0x12b   : > { %v3219_v61 = vpop.f32.mrb[13].mxu0  ;;  %v1457_v40 = vadd.f32 %v2945_v36, %v1456_v60 }
 0x1e4   : > { %v1835_v62 = vpop.f32.mrb[10].mxu1 }
 0x1e5   : > { %v3250_v63 = vpop.f32.mrb[11].mxu1  ;;  %v1848_v11 = vsel %vm1534_vm2, %v1835_v62, -inf }
 0x1eb   : > { %v1607_v0 = vpop.f32.mrb[14].mxu0 }
 0x1ec   : > { %v3235_v1 = vpop.f32.mrb[15].mxu0  ;;  %v1839_v2 = vsel %vm1534_vm2, %v1607_v0, -inf }
 0x1ed   : > { %1840 = vmax.xlane.f32.xlu0 %v1839_v2 }
 0x1ef   : > { %v1683_v4 = vpop.f32.mrb[16].mxu0 }
 0x1f0   : > { %v3240_v5 = vpop.f32.mrb[17].mxu0  ;;  %v1842_v6 = vsel %vm1534_vm2, %v1683_v4, -inf }
 0x1f1   : > { %1843 = vmax.xlane.f32.xlu0 %v1842_v6 }
 0x1f3   : > { %v1759_v7 = vpop.f32.mrb[18].mxu0 }
 0x1f4   : > { %v3245_v8 = vpop.f32.mrb[19].mxu0  ;;  %v1845_v10 = vsel %vm1534_vm2, %v1759_v7, -inf }
 0x1f5   : > { %1846 = vmax.xlane.f32.xlu1 %v1845_v10 }
 0x1f9   : > { %1849 = vmax.xlane.f32.xlu1 %v1848_v11 }
 0x27a   : > { %v1841_v12 = vpop.xlane.xlu0 %1840 }
 0x27b   : > { %v1851_v13 = vsub.f32 %v1607_v0, %v1841_v12 }
 0x27d   : > { %v1855_v14 = vmul.f32 1.442695, %v1851_v13 }
 0x27e   : > { %v1844_v15 = vpop.xlane.xlu0 %1843 }
 0x27f   : > { %3493 = vpow2.f32 %v1855_v14  ;;  %v1852_v16 = vsub.f32 %v1683_v4, %v1844_v15 }
 0x281   : > { %v1857_v17 = vmul.f32 1.442695, %v1852_v16 }
 0x282   : > { %v1847_v19 = vpop.xlane.xlu1 %1846 }
 0x283   : > { %3495 = vpow2.f32 %v1857_v17  ;;  %v1853_v20 = vsub.f32 %v1759_v7, %v1847_v19 }
 0x285   : > { %v1859_v21 = vmul.f32 1.442695, %v1853_v20 }
 0x286   : > { %v1850_v22 = vpop.xlane.xlu1 %1849 }
 0x287   : > { %3497 = vpow2.f32 %v1859_v21  ;;  %v1854_v23 = vsub.f32 %v1835_v62, %v1850_v22 }
 0x289   : > { %v3494_v24 = vpop.eup %3493  ;;  %v1861_v25 = vmul.f32 1.442695, %v1854_v23  ;;  %v2522_v23 = vld [vmem:[%s4385_s6] sm:$0xff] }
 0x28a   : > { %v1863_v26 = vsel %vm1534_vm2, %v3494_v24, 0.0 }
 0x28b   : > { %3499 = vpow2.f32 %v1861_v25  ;;  %1864 = vadd.xlane.f32.xlu0 %v1863_v26  ;;  %v2525_v26 = vld [vmem:[%s4385_s6 + $0x18] sm:$0xff] }
 0x28d   : > { %v3496_v27 = vpop.eup %3495 }
 0x28e   : > { %v1866_v28 = vsel %vm1534_vm2, %v3496_v27, 0.0 }
 0x28f   : > { %1867 = vadd.xlane.f32.xlu1 %v1866_v28  ;;  %v2615_v28 = vld [vmem:[%s4387_s8] sm:$0xff] }
 0x291   : > { %v3498_v29 = vpop.eup %3497 }
 0x292   : > { %v1869_v30 = vsel %vm1534_vm2, %v3498_v29, 0.0 }
 0x293   : > { %1870 = vadd.xlane.f32.xlu0 %v1869_v30 }
 0x295   : > { %v3500_v31 = vpop.eup %3499 }
 0x296   : > { %v1872_v32 = vsel %vm1534_vm2, %v3500_v31, 0.0 }
 0x297   : > { %1873 = vadd.xlane.f32.xlu1 %v1872_v32 }
 0x318   : > { %v1865_v33 = vpop.xlane.xlu0 %1864 }
 0x319   : > { %3501 = vrcp.f32 %v1865_v33 }
 0x31c   : > { %v1868_v34 = vpop.xlane.xlu1 %1867 }
 0x31d   : > { %3503 = vrcp.f32 %v1868_v34 }
 0x320   : > { %v1871_v35 = vpop.xlane.xlu0 %1870 }
 0x321   : > { %3505 = vrcp.f32 %v1871_v35  ;;  %v2976_v35 = vld [vmem:[%s4389_s10] ss:$0 sm:$0xff] }
 0x323   : > { %v3502_v37 = vpop.eup %3501 }
 0x324   : > { %v1879_v38 = vmul.f32 %v3502_v37, %v3494_v24  ;;  %v1874_v39 = vpop.xlane.xlu1 %1873  ;;  %v2523_v24 = vld [vmem:[%s4385_s6 + $0x8] sm:$0xff]  ;;  %v2977_v37 = vld [vmem:[%s4390_s11] ss:$0 sm:$0xff] }
 0x325   : > { %3507 = vrcp.f32 %v1874_v39  ;;  %v3410_v25 = vpack.c.bf16 %v2523_v24, %v2522_v23 }
 0x326   : > { %3254 = vmatmul.mubr.msk.f32.vlgmr.msra.gmra.mrb[20].mxu0 %vm1534_vm2, %v1879_v38  ;;  %1883 = vst.msk [vmem:[%s4089_s19] sm:$0xff] %vm1534_vm2, %v1879_v38 }
 0x327   : > { %v3504_v42 = vpop.eup %3503  ;;  %3262 = vmatpush3.msra.mxu0 %v1457_v40  ;;  %3263 = vmatprep.mubr.msk.f32.mxu0 %vm3640_vm0, %v3641_v9  ;;  %v2617_v40 = vld [vmem:[%s4387_s8 + $0x10] sm:$0xff] }
 0x328   : > { %v1880_v43 = vmul.f32 %v3504_v42, %v3496_v27  ;;  %3271 = vmatprep.subr.mxu0 %v3641_v9  ;;  %v3419_v42 = vpack.c.bf16 %v2618_v41, %v2617_v40 }
 0x32a   : > { %3259 = vmatmul.mubr.msk.f32.vlgmr.msra.gmra.mrb[12].mxu1 %vm1534_vm2, %v1880_v43  ;;  %1884 = vst.msk [vmem:[%s4089_s19 + $0x8] sm:$0xff] %vm1534_vm2, %v1880_v43  ;;  %v2619_v43 = vld [vmem:[%s4387_s8 + $0x20] sm:$0xff] }
 0x32b   : > { %v3506_v45 = vpop.eup %3505  ;;  %3267 = vmatpush3.msra.mxu1 %v1527_v44  ;;  %3268 = vmatprep.mubr.msk.f32.mxu1 %vm3640_vm0, %v3641_v9  ;;  %v2620_v44 = vld [vmem:[%s4387_s8 + $0x28] sm:$0xff] }
 0x32c   : > { %v1881_v46 = vmul.f32 %v3506_v45, %v3498_v29  ;;  %3276 = vmatprep.subr.mxu1 %v3641_v9  ;;  %v2616_v29 = vld [vmem:[%s4387_s8 + $0x8] sm:$0xff]  ;;  %v3422_v45 = vpack.c.bf16 %v2620_v44, %v2619_v43 }
 0x32d   : > { %v3416_v30 = vpack.c.bf16 %v2616_v29, %v2615_v28 }
 0x32e   : > { %3264 = vmatmul.mubr.msk.f32.vlgmr.msra.gmra.mrb[22].mxu0 %vm1534_vm2, %v1881_v46  ;;  %1885 = vst.msk [vmem:[%s4089_s19 + $0x10] sm:$0xff] %vm1534_vm2, %v1881_v46  ;;  %v2621_v46 = vld [vmem:[%s4387_s8 + $0x30] sm:$0xff] }
 0x32f   : > { %v3508_v47 = vpop.eup %3507  ;;  %3273 = vmatprep.mubr.msk.f32.mxu0 %vm3640_vm0, %v3641_v9  ;;  %3272 = vmatpush3.msra.mxu0 %v2179_v49  ;;  %v2623_v49 = vld [vmem:[%s4387_s8 + $0x40] sm:$0xff] }
 0x330   : > { %v1882_v48 = vmul.f32 %v3508_v47, %v3500_v31  ;;  %3281 = vmatprep.subr.mxu0 %v3641_v9  ;;  %v2622_v47 = vld [vmem:[%s4387_s8 + $0x38] sm:$0xff] }
 0x332   : > { %3269 = vmatmul.mubr.msk.f32.vlgmr.msra.gmra.mrb[14].mxu1 %vm1534_vm2, %v1882_v48  ;;  %1886 = vst.msk [vmem:[%s4089_s19 + $0x18] sm:$0xff] %vm1534_vm2, %v1882_v48  ;;  %v3425_v48 = vpack.c.bf16 %v2622_v47, %v2621_v46 }
 0x333   : > { %3278 = vmatprep.mubr.msk.f32.mxu1 %vm3640_vm0, %v3641_v9  ;;  %3277 = vmatpush3.msra.mxu1 %v2180_v50  ;;  %v2624_v50 = vld [vmem:[%s4387_s8 + $0x48] sm:$0xff] }
 0x334   : > { %3286 = vmatprep.subr.mxu1 %v3641_v9 }
 0x3f9   : > { %v1956_v52 = vpop.f32.mrb[20].mxu0 }
 0x3fa   : > { %v3255_v53 = vpop.f32.mrb[21].mxu0  ;;  %3274 = vmatmul.mubr.msk.f32.vlgmr.msra.gmra.mrb[24].mxu0 %vm1534_vm2, %v1956_v52  ;;  %v3428_v52 = vpack.c.bf16 %v2624_v50, %v2623_v49 }
 0x3fb   : > { %3282 = vmatpush3.msra.mxu0 %v2181_v51  ;;  %3283 = vmatprep.mubr.msk.f32.mxu0 %vm3640_vm0, %v3641_v9  ;;  %v2625_v51 = vld [vmem:[%s4387_s8 + $0x50] sm:$0xff]  ;;  %v2626_v53 = vld [vmem:[%s4387_s8 + $0x58] sm:$0xff] }
 0x3fc   : > { %3409 = vmatprep.subr.bf16.mxu0 %v3639_v3 }
 0x3fd   : > { %v2029_v55 = vpop.f32.mrb[12].mxu1 }
 0x3fe   : > { %v3260_v56 = vpop.f32.mrb[13].mxu1  ;;  %3279 = vmatmul.mubr.msk.f32.vlgmr.msra.gmra.mrb[16].mxu1 %vm1534_vm2, %v2029_v55  ;;  %v2627_v55 = vld [vmem:[%s4387_s8 + $0x60] sm:$0xff] }
 0x3ff   : > { %3287 = vmatpush3.msra.mxu1 %v2182_v54  ;;  %3288 = vmatprep.mubr.msk.f32.mxu1 %vm3640_vm0, %v3641_v9  ;;  %v3431_v54 = vpack.c.bf16 %v2626_v53, %v2625_v51  ;;  %v2628_v56 = vld [vmem:[%s4387_s8 + $0x68] sm:$0xff] }
 0x400   : > { %3415 = vmatprep.subr.bf16.mxu1 %v3639_v3 }
 0x401   : > { %v2102_v57 = vpop.f32.mrb[22].mxu0 }
 0x402   : > { %v3265_v58 = vpop.f32.mrb[23].mxu0  ;;  %3284 = vmatmul.mubr.msk.f32.vlgmr.msra.gmra.mrb[26].mxu0 %vm1534_vm2, %v2102_v57  ;;  %v3434_v57 = vpack.c.bf16 %v2628_v56, %v2627_v55 }
 0x403   : > { %3299 = vmatprep.mubr.msk.f32.mxu0 %vm3640_vm0, %v3641_v9  ;;  %3411 = vmatpush3.bf16.msra.mxu0 %v3410_v25  ;;  %v2629_v58 = vld [vmem:[%s4387_s8 + $0x70] sm:$0xff] }
 0x404   : > { %3412 = vmatprep.subr.bf16.mxu0 %v3639_v3 }
 0x405   : > { %v2175_v59 = vpop.f32.mrb[14].mxu1 }
 0x406   : > { %v3270_v60 = vpop.f32.mrb[15].mxu1  ;;  %3289 = vmatmul.mubr.msk.f32.vlgmr.msra.gmra.mrb[18].mxu1 %vm1534_vm2, %v2175_v59  ;;  %v2630_v59 = vld [vmem:[%s4387_s8 + $0x78] sm:$0xff] }
 0x407   : > { %3334 = vmatprep.mubr.msk.f32.mxu1 %vm3640_vm0, %v3641_v9  ;;  %v2975_v9 = vld [vmem:[%s4384_s5] ss:$0 sm:$0xff]  ;;  %3417 = vmatpush3.bf16.msra.mxu1 %v3416_v30  ;;  %v3437_v60 = vpack.c.bf16 %v2630_v59, %v2629_v58 }
 0x408   : > { %3418 = vmatprep.subr.bf16.mxu1 %v3639_v3 }
 0x40b   : > { %3420 = vmatpush3.bf16.msra.mxu1 %v3419_v42 }
 0x40c   : > { %3421 = vmatprep.subr.bf16.mxu1 %v3639_v3 }
 0x40f   : > { %3423 = vmatpush3.bf16.msra.mxu1 %v3422_v45 }
 0x410   : > { %3424 = vmatprep.subr.bf16.mxu1 %v3639_v3 }
 0x413   : > { %3426 = vmatpush3.bf16.msra.mxu1 %v3425_v48 }
 0x414   : > { %3427 = vmatprep.subr.bf16.mxu1 %v3639_v3 }
 0x417   : > { %3429 = vmatpush3.bf16.msra.mxu1 %v3428_v52 }
 0x418   : > { %3430 = vmatprep.subr.bf16.mxu1 %v3639_v3 }
 0x41b   : > { %3432 = vmatpush3.bf16.msra.mxu1 %v3431_v54 }
 0x41c   : > { %3433 = vmatprep.subr.bf16.mxu1 %v3639_v3 }
 0x41f   : > { %3435 = vmatpush3.bf16.msra.mxu1 %v3434_v57 }
 0x420   : > { %3436 = vmatprep.subr.bf16.mxu1 %v3639_v3 }
 0x423   : > { %3438 = vmatpush3.bf16.msra.mxu1 %v3437_v60 }
 0x4cd   : > { %v2252_v61 = vpop.f32.mrb[24].mxu0 }
 0x4ce   : > { %v3275_v62 = vpop.f32.mrb[25].mxu0  ;;  %v2475_v0 = vsel %vm686_vm1, %v2252_v61, 0.0  ;;  %v2978_v61 = vld [vmem:[%s4386_s7] ss:$0 sm:$0xff] }
 0x4d1   : > { %v2325_v63 = vpop.f32.mrb[16].mxu1 }
 0x4d2   : > { %v2476_v1 = vsel %vm686_vm1, %v2325_v63, 0.0  ;;  %v3280_v2 = vpop.f32.mrb[17].mxu1 }
 0x4d3   : > { %v2477_v4 = vadd.f32 %v2476_v1, %v2475_v0 }
 0x4d5   : > { %v2398_v5 = vpop.f32.mrb[26].mxu0 }
 0x4d6   : > { %v2478_v6 = vsel %vm686_vm1, %v2398_v5, 0.0  ;;  %v3285_v7 = vpop.f32.mrb[27].mxu0 }
 0x4d7   : > { %v2479_v8 = vadd.f32 %v2478_v6, %v2477_v4 }
 0x4d9   : > { %v2471_v10 = vpop.f32.mrb[18].mxu1 }
 0x4da   : > { %v2480_v11 = vsel %vm686_vm1, %v2471_v10, 0.0  ;;  %v3290_v12 = vpop.f32.mrb[19].mxu1 }
 0x4db   : > { %v2481_v13 = vadd.f32 %v2480_v11, %v2479_v8  ;;  %v553_v11 = vld [vmem:[%s551_s30] sm:$0xff]  ;;  %s2791_s30 = sshll.u32 %s4089_s19, 4  ;;  %s4289_s30 = int_to_ptr.vmem [resolvable:$true] %s2791_s30 }
 0x4dd   : > { %v4148_v14 = vadd.f32 %v2975_v9, %v2481_v13  ;;  %v2980_v9 = vld [vmem:[%s4388_s9] ss:$0 sm:$0xff] }
 0x4df   : > { %v2490_v15 = vadd.f32 %v4148_v14, %v3836_v18  ;;  %v2524_v18 = vld [vmem:[%s4385_s6 + $0x10] sm:$0xff]  ;;  %v2491_v13 = vadd.f32 %v4148_v14, %v553_v11 }
 0x4e0   : > { %v3413_v27 = vpack.c.bf16 %v2525_v26, %v2524_v18 }
 0x4e1   : > { %v2494_v16 = vsel %vm686_vm1, %v2490_v15, 0.0 }
 0x4e2   : > { %2495 = vadd.xlane.f32.xlu0 %v2494_v16  ;;  %3414 = vmatpush3.bf16.msra.mxu0 %v3413_v27 }
 0x56f   : > { %v2496_v17 = vpop.xlane.xlu0 %2495 }
 0x570   : > { %v2498_v19 = vmul.f32 0.03125, %v2496_v17 }
 0x572   : > { %v2499_v20 = vsub.f32 %v2490_v15, %v2498_v19 }
 0x574   : > { %v2500_v21 = vmul.f32 %v2499_v20, %v2499_v20 }
 0x576   : > { %v2501_v22 = vsel %vm686_vm1, %v2500_v21, 0.0 }
 0x577   : > { %2502 = vadd.xlane.f32.xlu1 %v2501_v22 }
 0x604   : > { %v2503_v31 = vpop.xlane.xlu1 %2502 }
 0x605   : > { %v2504_v32 = vmul.f32 0.03125, %v2503_v31 }
 0x607   : > { %v2505_v33 = vadd.f32 1e-05, %v2504_v32 }
 0x609   : > { %3509 = vrsqrt.f32 %v2505_v33 }
 0x613   : > { %v3510_v34 = vpop.eup %3509 }
 0x614   : > { %v2507_v36 = vmul.f32 %v3510_v34, %v2499_v20 }
 0x616   : > { %v2514_v38 = vmul.f32 %v2976_v35, %v2507_v36 }
 0x618   : > { %v2521_v39 = vadd.f32 %v2977_v37, %v2514_v38 }
 0x61a   : > { %3300 = vmatmul.mubr.msk.f32.vlgmr.msra.gmra.mrb[28].mxu0 %vm686_vm1, %v2521_v39 }
 0x6ed   : > { %v2602_v62 = vpop.f32.mrb[28].mxu0 }
 0x6ee   : > { %v2603_v63 = vadd.f32 %v2978_v61, %v2602_v62  ;;  %v3301_v0 = vpop.f32.mrb[29].mxu0 }
 0x6f0   : > { %v2606_v1 = vmul.f32 %v2603_v63, %v2603_v63 }
 0x6f2   : > { %v2607_v2 = vmul.f32 %v2606_v1, %v2603_v63 }
 0x6f4   : > { %v2608_v4 = vmul.f32 0.044715, %v2607_v2 }
 0x6f6   : > { %v2609_v5 = vadd.f32 %v2608_v4, %v2603_v63 }
 0x6f8   : > { %v2610_v6 = vmul.f32 0.7978846, %v2609_v5 }
 0x6fa   : > { %3511 = vtanh.f32 %v2610_v6 }
 0x704   : > { %v3512_v7 = vpop.eup %3511 }
 0x705   : > { %v2612_v8 = vadd.f32 1.0, %v3512_v7 }
 0x707   : > { %v2613_v3 = vmul.f32 0.5, %v2612_v8 }
 0x709   : > { %v2614_v10 = vmul.f32 %v2613_v3, %v2603_v63 }
 0x70b   : > { %3335 = vmatmul.mubr.f32.vlgmr.msra.gmra.mrb[20].mxu1 %v2614_v10 }
 0x7de   : > { %v2704_v12 = vpop.f32.mrb[20].mxu1 }
 0x7df   : > { %v2705_v15 = vadd.f32 %v2980_v9, %v2704_v12  ;;  %v3336_v16 = vpop.f32.mrb[21].mxu1 }
 0x7e1   : > { %v2709_v17 = vadd.f32 %v2705_v15, %v2491_v13  ;;  %v2708_v19 = vadd.f32 %v2705_v15, %v2521_v39 }
 0x7e3   : > { %v2713_v20 = vsel %vm686_vm1, %v2708_v19, 0.0  ;;  %2710 = vst.msk [vmem:[%s536_s18] sm:$0xff] %vm686_vm1, %v2709_v17 }
 0x7e4   : > { %2714 = vadd.xlane.f32.xlu0 %v2713_v20 }
 0x871   : > { %v2715_v21 = vpop.xlane.xlu0 %2714 }
 0x872   : > { %v2716_v22 = vmul.f32 0.03125, %v2715_v21 }
 0x874   : > { %v4246_v23 = vsub.f32 %v2708_v19, %v2716_v22 }
 0x876   : > { %v2718_v14 = vmul.f32 %v4246_v23, %v4246_v23 }
 0x878   : > { %v2719_v24 = vsel %vm686_vm1, %v2718_v14, 0.0 }
 0x879   : > { %2720 = vadd.xlane.f32.xlu1 %v2719_v24 }
 0x87a   : > { %3528 = shalt.err (!%p3525_p3)
}
 0x87b   : > { %s3529_s18 = scalar_lea.hbm %s4258_s24, 128  ;;  %s3533_s20 = scalar_lea.hbm %s4394_s15, 256 }
 0x87c   : > { %p3530_p4 = scmp.ne.s32.totalorder %s4258_s24, %s3529_s18  ;;  %p3534_p9 = scmp.lt.u32.totalorder %s4258_s24, %s4394_s15 }
 0x87d   : > { %p3535_p10 = scmp.lt.u32.totalorder %s3533_s20, %s3529_s18  ;;  %p3537_p12 = scmp.lt.u32.totalorder %s3529_s18, %s4258_s24 }
 0x87e   : > { %p3531_p7 = pnand %p3530_p4, %p3772_p5 }
 0x87f   : > { %p3536_p11 = por %p3535_p10, %p3534_p9 }
 0x880   : > { %p3532_p8 = pneg %p3531_p7 }
 0x881   : > { %p3538_p13 = por %p3537_p12, %p3536_p11 }
 0x883   : > { %p3539_p0 = pnand %p3538_p13, %p3532_p8 }
 0x885   : > { %3542 = shalt.err (!%p3539_p0)
}
 0x886   : > { %3440 = dma.vmem_to_hbm [thread:$0]  (%p3772_p5), %s4260_s23, 128, %s4258_s24, %s4263_s2  }
 0x887   : > { %s2992_s26 = sshll.u32 %s3753_s25, 9  ;;  %s3543_s28 = scalar_lea.vmem %s4289_s30, 512 }
 0x888   : > { %s4295_s18 = scalar_lea.hbm %s4395_s16, %s2992_s26  ;;  %p3544_p1 = scmp.ne.s32.totalorder %s4289_s30, %s3543_s28 }
 0x889   : > { %s3643_s21 = smov [#allocation6]  }
 0x88a   : > { %p3545_p2 = pnand %p3544_p1, %p3772_p5  ;;  %s3547_s20 = sshll.u32 %s3643_s21, 4  ;;  %s3548_s20 = int_to_ptr.vmem [resolvable:$false] %s3547_s20 }
 0x88b   : > { %s3549_s19 = scalar_lea.vmem %s3548_s20, 1024  ;;  %p3550_p4 = scmp.lt.s32.totalorder %s4289_s30, %s3548_s20 }
 0x88c   : > { %p3546_p3 = pneg %p3545_p2  ;;  %p3551_p7 = scmp.lt.s32.totalorder %s3549_s19, %s3543_s28 }
 0x88e   : > { %p3552_p8 = por %p3551_p7, %p3550_p4 }
 0x890   : > { %p3553_p9 = pnand %p3552_p8, %p3546_p3 }
 0x892   : > { %3556 = shalt.err (!%p3553_p9)
}
 0x893   : > { %s3557_s24 = scalar_lea.hbm %s4295_s18, 512  ;;  %s3561_s26 = scalar_lea.hbm %s4395_s16, 1024 }
 0x894   : > { %p3558_p10 = scmp.ne.s32.totalorder %s4295_s18, %s3557_s24  ;;  %p3562_p13 = scmp.lt.u32.totalorder %s4295_s18, %s4395_s16 }
 0x895   : > { %p3563_p0 = scmp.lt.u32.totalorder %s3561_s26, %s3557_s24  ;;  %p3565_p2 = scmp.lt.u32.totalorder %s3557_s24, %s4295_s18 }
 0x896   : > { %p3559_p11 = pnand %p3558_p10, %p3772_p5 }
 0x897   : > { %p3564_p1 = por %p3563_p0, %p3562_p13 }
 0x898   : > { %p3560_p12 = pneg %p3559_p11 }
 0x899   : > { %p3566_p3 = por %p3565_p2, %p3564_p1 }
 0x89b   : > { %p3567_p4 = pnand %p3566_p3, %p3560_p12 }
 0x89d   : > { %3570 = shalt.err (!%p3567_p4)
}
 0x89e   : > { %s3644_s28 = smov 128   ;;  %s3645_s21 = smov 8   ;;  %v2981_v28 = vld [vmem:[%s4391_s12] ss:$0 sm:$0xff] }
 0x89f   : > { %3441 = dma.vmem_to_hbm [thread:$0]  (%p3772_p5), %s4289_s30, 512, %s4295_s18, %s4263_s2, %s3644_s28, %s3644_s28, %s3645_s21  }
 0x8a0   : > { %v2982_v30 = vld [vmem:[%s4392_s13] ss:$0 sm:$0xff]  ;;  %s4422_s1 = sshll.u32 %s4079_s27, 3  ;;  %s4423_s2 = sshll.u32 %s3753_s25, 7 }
 0x8a1   : > { %s529_s26 = scalar_lea.vmem [#allocation2], %s4422_s1  ;;  %s4333_s17 = scalar_lea.hbm %s4393_s14, %s4423_s2 }
 0x8a2   : > { %s2765_s30 = sshll.u32 %s529_s26, 4  ;;  %s2742_s28 = scalar_lea.sflag [#allocation3], %s4079_s27  ;;  %s4335_s30 = int_to_ptr.vmem [resolvable:$true] %s2765_s30 }
 0x8a3   : > { %s3571_s21 = scalar_lea.vmem %s4335_s30, 128  ;;  %s3646_s20 = smov [#allocation2]  }
 0x8a4   : > { %p3572_p7 = scmp.ne.s32.totalorder %s4335_s30, %s3571_s21  ;;  %s3575_s25 = sshll.u32 %s3646_s20, 4  ;;  %s3576_s25 = int_to_ptr.vmem [resolvable:$false] %s3575_s25 }
 0x8a5   : > { %s3577_s19 = scalar_lea.vmem %s3576_s25, 256  ;;  %p3578_p10 = scmp.lt.s32.totalorder %s4335_s30, %s3576_s25 }
 0x8a6   : > { %p3573_p8 = pnand %p3572_p7, %p3772_p5  ;;  %p3579_p11 = scmp.lt.s32.totalorder %s3577_s19, %s3571_s21 }
 0x8a8   : > { %p3574_p9 = pneg %p3573_p8  ;;  %p3580_p12 = por %p3579_p11, %p3578_p10 }
 0x8aa   : > { %p3581_p13 = pnand %p3580_p12, %p3574_p9 }
 0x906   : > { %v2721_v25 = vpop.xlane.xlu1 %2720 }
 0x907   : > { %v2722_v18 = vmul.f32 0.03125, %v2721_v25 }
 0x909   : > { %v2723_v26 = vadd.f32 1e-05, %v2722_v18 }
 0x90b   : > { %3513 = vrsqrt.f32 %v2723_v26 }
 0x915   : > { %v3514_v27 = vpop.eup %3513 }
 0x916   : > { %v2725_v29 = vmul.f32 %v3514_v27, %v4246_v23 }
 0x918   : > { %v2732_v31 = vmul.f32 %v2981_v28, %v2725_v29 }
 0x91a   : > { %v2739_v32 = vadd.f32 %v2982_v30, %v2732_v31 }
 0x91c   : > { %2740 = vst.msk [vmem:[%s529_s26] sm:$0xff] %vm686_vm1, %v2739_v32 }
 0x91d   : > { %3584 = shalt.err (!%p3581_p13)
}
 0x91e   : > { %s3585_s27 = scalar_lea.hbm %s4333_s17, 128  ;;  %s3589_s1 = scalar_lea.hbm %s4393_s14, 256 }
 0x91f   : > { %p3586_p0 = scmp.ne.s32.totalorder %s4333_s17, %s3585_s27  ;;  %p3590_p3 = scmp.lt.u32.totalorder %s4333_s17, %s4393_s14 }
 0x920   : > { %p3591_p4 = scmp.lt.u32.totalorder %s3589_s1, %s3585_s27  ;;  %p3593_p8 = scmp.lt.u32.totalorder %s3585_s27, %s4333_s17 }
 0x921   : > { %p3587_p1 = pnand %p3586_p0, %p3772_p5 }
 0x922   : > { %p3592_p7 = por %p3591_p4, %p3590_p3 }
 0x923   : > { %p3588_p2 = pneg %p3587_p1 }
 0x924   : > { %p3594_p9 = por %p3593_p8, %p3592_p7 }
 0x926   : > { %p3595_p10 = pnand %p3594_p9, %p3588_p2 }
 0x928   : > { %3598 = shalt.err (!%p3595_p10)
}
 0x929   : > { %3439 = dma.vmem_to_hbm [thread:$0]  (%p3772_p5), %s4335_s30, 128, %s4333_s17, %s2742_s28  }
 0x92a PF: > { %s4424_s18 = sld [smem:[#allocation11_spill]]  ;;  %s4425_s29 = sld [smem:[#allocation9_spill]] }
 0x930   : > { %p3455_p11 = scmp.ge.s32.totalorder %s4424_s18, 2  ;;  %s2806_s20 = sand.u32 1, %s4425_s29  }
 0x931   : > { %s2807_s25 = scalar_lea.sflag [#allocation3], %s2806_s20 }
 0x932   : > { %p3446_p12 = pnand %p3455_p11, %p3776_p6 }
 0x934   : > { %3616 = dma.done.wait (!%p3446_p12), %s2807_s25, 128  }
 0x935   : > { %3618 = vsyncadd (!%p3446_p12), %s2807_s25, 4294967168  ;;  %s4427_s19 = sadd.s32 4294967294, %s4424_s18  }
 0x936   : > { %s2815_s27 = sand.u32 1, %s4427_s19  }
 0x937   : > { %s2816_s24 = scalar_lea.sflag [#allocation5], %s2815_s27 }
 0x938   : > { %3620 = dma.done.wait (!%p3446_p12), %s2816_s24, 640  }
 0x939   : > { %3622 = vsyncadd (!%p3446_p12), %s2816_s24, 4294966656  ;;  %s4428_s24 = sld [smem:[#allocation12_spill]]  ;;  %s4429_s0 = sld [smem:[#allocation10_spill]] }
 0x93a   : > { %s4430_s23 = sld [smem:[#allocation13_spill]]  ;;  %s4431_s21 = smov %s3629_s22 }
 0x93f   : > { %p30_p5 = scmp.ge.s32.totalorder %s4428_s24, 4   ;;  %s4432_s22 = smov %s4429_s0 }
 0x941   :  { %32 = sbr.rel (!%p30_p5) target bundleno = 9 (0x9), region = 146 }
 0x948   :  { %2830 = vsyncpa [#allocation3], 1 }
 0x949   :  { %2832 = vsyncpa [#allocation3 + $0x1], 1 }
 0x94a   :  { %2833 = vsyncpa [#allocation5], 1 }
 0x94b   :  { %2835 = vsyncpa [#allocation5 + $0x1], 1 }

</bundles_post_ra>
